<compile_context>
chip_gen: v7x
topology: tpu7x:2x2x1
jax: 0.10.0
libtpu: 0.0.40
codegen_flags: <defaults>
</compile_context>

<pallas_src>
import jax
import jax.numpy as jnp
from jax import lax
from jax.experimental import pallas as pl
from jax.experimental.pallas import tpu as pltpu

NEGATIVE_SLOPE = 0.1  # LeakyReLU slope; 0.0 -> plain ReLU.


def conv_same_padding(kernel_size: int) -> int:
    # "same" padding for odd kernels (mirrors the original helper's intent).
    return (kernel_size - 1) // 2


# ---------------------------------------------------------------------------
# Host-side weight transform.
#
# conv weight (K, K, Ci, Co) -> ONE fused banded matrix of shape
# (K*lane_stride, Wo*Co) such that, with the activation stored as (H, Wi*Ci)
# (lane index = w*Ci + ci) and the K height-shifted windows staged side by
# side at lane offsets kh*lane_stride,
#     out[h, wo*Co + co] = staged[h, :] @ M_fused
# is exactly the "same"-padded conv with width stride `stride_w`.
# The rows [wc_in : lane_stride] of every tap block are zero, so whatever
# finite stale data sits in the matching (never-written) staging columns
# contributes exactly 0.
# ---------------------------------------------------------------------------
def build_banded_conv(w, b, w_in, stride_w, k, lane_stride):
    p = conv_same_padding(k)
    ci, co = w.shape[2], w.shape[3]
    w_out = (w_in + 2 * p - k) // stride_w + 1
    wi_idx = jnp.arange(w_in)
    wo_idx = jnp.arange(w_out)
    kw_idx = jnp.arange(k)
    # sel[kw, wi, wo] = 1 iff unpadded input col wi feeds output col wo via
    # tap kw (zero-padding columns simply have no row -> contribute 0).
    sel = (wi_idx[None, :, None]
           == wo_idx[None, None, :] * stride_w + kw_idx[:, None, None] - p)
    sel = sel.astype(w.dtype)
    # M[kh, wi, ci, wo, co] = sum_kw sel[kw, wi, wo] * w[kh, kw, ci, co]
    m = jnp.einsum("kiw,hkcd->hicwd", sel, w)
    m = m.reshape(k, w_in * ci, w_out * co)
    # Pad each tap block to lane_stride contraction rows and flatten the k
    # taps into one matrix -> a single MXU matmul per conv in the kernel.
    m_flat = jnp.zeros((k, lane_stride, w_out * co), w.dtype)
    m_flat = m_flat.at[:, : w_in * ci, :].set(m)
    m_flat = m_flat.reshape(k * lane_stride, w_out * co)
    b_row = jnp.tile(b, (w_out,)).reshape(1, w_out * co)   # lane idx = w*Co+co
    return m_flat, b_row, w_out


def prepare_banded_params(params, w_img, k):
    """(w, b) per conv -> fused banded operands + static shape metadata."""
    p = conv_same_padding(k)
    # Pass 1: static shapes per conv.
    meta = []
    w_cur, ci = w_img, 1
    for layer in params:
        for idx, (w, _) in enumerate(layer):
            stride_w = 3 if idx == 2 else 1
            co = w.shape[-1]
            w_out = (w_cur + 2 * p - k) // stride_w + 1
            meta.append((w_cur, ci, w_out, co, stride_w))
            w_cur, ci = w_out, co
    max_wc_in = max(wi * c for (wi, c, _, _, _) in meta)
    lane_stride = ((max_wc_in + 127) // 128) * 128   # 128-aligned tap blocks
    # Pass 2: build the fused banded matrices.
    prepared = []
    flat_params = [wb for layer in params for wb in layer]
    for (w, b), (w_in, _, _, _, stride_w) in zip(flat_params, meta):
        m_flat, b_row, _ = build_banded_conv(w, b, w_in, stride_w, k, lane_stride)
        prepared.append((m_flat, b_row))
    meta = tuple((wi, c, wo, co) for (wi, c, wo, co, _) in meta)
    return prepared, meta, lane_stride


# ---------------------------------------------------------------------------
# Fused kernel: whole network for a tile of b_tile sublane-stacked images.
# ---------------------------------------------------------------------------
def _make_kernel(meta, h, b_tile, k, p, lane_stride):
    n_conv = len(meta)
    bh = b_tile * h

    def kernel(*refs):
        x_ref = refs[0]
        mb_refs = refs[1:1 + 2 * n_conv]
        o_ref = refs[1 + 2 * n_conv]
        stg = refs[2 + 2 * n_conv]          # (bh, k*lane_stride) staging slab

        # Zero the staging slab once per grid step (~a dozen vector stores).
        # Needed only for the lane-padding tail columns of each tap block:
        # every dot reads them (against zero weight rows) but no conv writes
        # them, and uninitialized scratch VMEM could hold NaN (0*NaN = NaN).
        # After this, stale tails only ever hold finite activations -> *0 = 0.
        stg[...] = jnp.zeros_like(stg)

        y = x_ref[...]                      # (bh, w_img); Ci == 1 for conv 0
        for i, (w_in, ci, w_out, co) in enumerate(meta):
            m_ref, b_ref = mb_refs[2 * i], mb_refs[2 * i + 1]
            wc_in = w_in * ci

            # Stage the k height taps side by side (each at a 128-aligned lane
            # offset):  stg[r, kh*lane_stride + j] = Xpad[r + kh, j]  where
            # Xpad is y with p zero rows above/below *per image*.  Only the
            # 2p per-image boundary rows need explicit zeroing; the interior
            # is fully overwritten each conv.
            for kh in range(k):
                s = kh - p                  # sublane shift of this tap
                c0 = kh * lane_stride
                if s == 0:
                    stg[0:bh, c0:c0 + wc_in] = y
                elif s > 0:
                    stg[0:bh - s, c0:c0 + wc_in] = y[s:bh, :]
                    for img in range(b_tile):           # bottom pad rows
                        r = img * h + h - s
                        stg[r:r + s, c0:c0 + wc_in] = jnp.zeros((s, wc_in), y.dtype)
                else:
                    stg[-s:bh, c0:c0 + wc_in] = y[0:bh + s, :]
                    for img in range(b_tile):           # top pad rows
                        r = img * h
                        stg[r:r - s, c0:c0 + wc_in] = jnp.zeros((-s, wc_in), y.dtype)

            # ONE fused MXU matmul for all k taps of this conv
            # (previously k small dependent dots + VPU adds).
            z = jnp.dot(stg[...], m_ref[...], preferred_element_type=jnp.float32)
            z = z + b_ref[...]
            y = jnp.maximum(z, NEGATIVE_SLOPE * z)      # LeakyReLU(0.1)

        o_ref[...] = y                      # (bh, W_last*C_last)

    return kernel


def choose_batch_tile(n: int) -> int:
    """Images per grid step.

    v5e/v6e have a single TensorCore: a batch grid is a purely serial loop
    paying ~0.35 us per step, so fold the whole batch into ONE grid step
    (images stacked along sublanes).  v7x has 2 TensorCores: keep one image
    per step so the "parallel" grid axis shards the batch across cores.
    """
    try:
        kind = jax.devices()[0].device_kind.lower()
    except Exception:
        kind = ""
    dual_tc = ("v7" in kind) or ("7x" in kind)
    return 1 if dual_tc else n


def build_forward(meta, h, w_img, k, lane_stride, b_tile):
    p = conv_same_padding(k)
    assert h % 8 == 0, "sublane block size must be a multiple of 8"
    w_last, c_last = meta[-1][2], meta[-1][3]
    out_wc = w_last * c_last
    kernel = _make_kernel(meta, h, b_tile, k, p, lane_stride)

    @jax.jit
    def forward(x, prepared):
        n = x.shape[0]
        assert n % b_tile == 0
        steps = n // b_tile
        x2 = x.reshape(n * h, w_img)        # sublane-stacked batch

        flat = [x2]
        in_specs = [pl.BlockSpec((b_tile * h, w_img), lambda i: (i, 0))]
        for m, b_row in prepared:
            flat.append(m)
            in_specs.append(pl.BlockSpec(m.shape, lambda i: (0, 0)))
            flat.append(b_row)
            in_specs.append(pl.BlockSpec(b_row.shape, lambda i: (0, 0)))

        # Advisory cost so XLA can schedule/overlap this micro-kernel.
        flops = 2 * n * h * sum(k * wi * ci * wo * co
                                for (wi, ci, wo, co) in meta)
        bytes_accessed = 4 * (x2.size + n * h * out_wc
                              + sum(m.size + br.size for m, br in prepared))
        cost = pl.CostEstimate(flops=flops, transcendentals=0,
                               bytes_accessed=bytes_accessed)

        out = pl.pallas_call(
            kernel,
            out_shape=jax.ShapeDtypeStruct((n * h, out_wc), jnp.float32),
            grid=(steps,),
            in_specs=in_specs,
            out_specs=pl.BlockSpec((b_tile * h, out_wc), lambda i: (i, 0)),
            scratch_shapes=[pltpu.VMEM((b_tile * h, k * lane_stride),
                                       jnp.float32)],
            compiler_params=pltpu.CompilerParams(
                dimension_semantics=("parallel",)),
            cost_estimate=cost,
        )(*flat)

        # (N*H, W*C) lane layout -> NCHW, matching the PyTorch module output.
        # Tiny (2 KiB) and fused by XLA inside this jit; consumers that accept
        # the (N, H, W*C) layout can skip it entirely.
        return jnp.transpose(out.reshape(n, h, w_last, c_last), (0, 3, 1, 2))

    return forward


# ---------------------------------------------------------------------------
# Params / reference
# ---------------------------------------------------------------------------
def init_params(key, cnn_channels, k):
    """Deterministic synthetic params (kaiming_uniform-style for weights)."""
    params = []
    in_c = 1
    for ch in cnn_channels:
        layer = []
        for (ci, co) in [(in_c, ch), (ch, ch), (ch, ch)]:
            key, wk, bk = jax.random.split(key, 3)
            fan_in = ci * k * k
            bound_w = (6.0 / fan_in) ** 0.5     # kaiming_uniform_, relu gain
            bound_b = 1.0 / fan_in ** 0.5       # default Conv2d bias init
            w = jax.random.uniform(wk, (k, k, ci, co), jnp.float32,
                                   -bound_w, bound_w)
            b = jax.random.uniform(bk, (co,), jnp.float32, -bound_b, bound_b)
            layer.append((w, b))
        params.append(layer)
        in_c = ch
    return params


def _ref_forward(x, params, k, neg_slope):
    """Pure-JAX/XLA reference (NCHW, same padding/stride semantics)."""
    y = x[:, None, :, :]
    p = conv_same_padding(k)
    for layer in params:
        for i, (w, b) in enumerate(layer):
            stride = (1, 3) if i == 2 else (1, 1)
            w_oihw = jnp.transpose(w, (3, 2, 0, 1))
            y = lax.conv_general_dilated(
                y, w_oihw, window_strides=stride,
                padding=[(p, p), (p, p)],
                dimension_numbers=("NCHW", "OIHW", "NCHW"))
            y = y + b[None, :, None, None]
            y = jnp.maximum(y, neg_slope * y)
    return y


if __name__ == "__main__":
    cnn_channels = [4, 8]
    cnn_kernel_size = 3

    key = jax.random.PRNGKey(0)
    key, xk = jax.random.split(key)
    x = jax.random.normal(xk, (2, 16, 16), jnp.float32)   # (batch, H, W)

    params = init_params(key, cnn_channels, cnn_kernel_size)
    prepared, meta, lane_stride = prepare_banded_params(
        params, w_img=x.shape[2], k=cnn_kernel_size)
    b_tile = choose_batch_tile(x.shape[0])
    forward = build_forward(meta, h=x.shape[1], w_img=x.shape[2],
                            k=cnn_kernel_size, lane_stride=lane_stride,
                            b_tile=b_tile)

    out = jax.block_until_ready(forward(x, prepared))
    ref = jax.block_until_ready(_ref_forward(x, params, cnn_kernel_size,
                                             NEGATIVE_SLOPE))

    assert out.shape == ref.shape, (out.shape, ref.shape)
    max_err = float(jnp.max(jnp.abs(out - ref)))
    assert jnp.allclose(out, ref, atol=1e-3, rtol=1e-3), max_err
    print("KERNEL_OK")
</pallas_src>

<mosaic_0001>
module attributes {stable_mosaic.version = 11 : i64} {
  func.func @kernel(%arg0: i32, %arg1: memref<32x16xf32, #tpu.memory_space<vmem>>, %arg2: memref<384x64xf32, #tpu.memory_space<vmem>>, %arg3: memref<1x64xf32, #tpu.memory_space<vmem>>, %arg4: memref<384x64xf32, #tpu.memory_space<vmem>>, %arg5: memref<1x64xf32, #tpu.memory_space<vmem>>, %arg6: memref<384x24xf32, #tpu.memory_space<vmem>>, %arg7: memref<1x24xf32, #tpu.memory_space<vmem>>, %arg8: memref<384x48xf32, #tpu.memory_space<vmem>>, %arg9: memref<1x48xf32, #tpu.memory_space<vmem>>, %arg10: memref<384x48xf32, #tpu.memory_space<vmem>>, %arg11: memref<1x48xf32, #tpu.memory_space<vmem>>, %arg12: memref<384x16xf32, #tpu.memory_space<vmem>>, %arg13: memref<1x16xf32, #tpu.memory_space<vmem>>, %arg14: memref<32x16xf32, #tpu.memory_space<vmem>>, %arg15: memref<32x384xf32, #tpu.memory_space<vmem>>) attributes {dimension_semantics = [#tpu.dimension_semantics<parallel>], iteration_bounds = array<i64: 1>, scalar_prefetch = 0 : i64, scratch_operands = 1 : i64, tpu.core_type = #tpu.core_type<tc>, window_params = [{transform_indices = @transform_0, window_bounds = array<i64: 32, 16>}, {pipeline_mode = #tpu.pipeline_mode<synchronous>, transform_indices = @transform_1, window_bounds = array<i64: 384, 64>}, {pipeline_mode = #tpu.pipeline_mode<synchronous>, transform_indices = @transform_2, window_bounds = array<i64: 1, 64>}, {pipeline_mode = #tpu.pipeline_mode<synchronous>, transform_indices = @transform_3, window_bounds = array<i64: 384, 64>}, {pipeline_mode = #tpu.pipeline_mode<synchronous>, transform_indices = @transform_4, window_bounds = array<i64: 1, 64>}, {pipeline_mode = #tpu.pipeline_mode<synchronous>, transform_indices = @transform_5, window_bounds = array<i64: 384, 24>}, {pipeline_mode = #tpu.pipeline_mode<synchronous>, transform_indices = @transform_6, window_bounds = array<i64: 1, 24>}, {pipeline_mode = #tpu.pipeline_mode<synchronous>, transform_indices = @transform_7, window_bounds = array<i64: 384, 48>}, {pipeline_mode = #tpu.pipeline_mode<synchronous>, transform_indices = @transform_8, window_bounds = array<i64: 1, 48>}, {pipeline_mode = #tpu.pipeline_mode<synchronous>, transform_indices = @transform_9, window_bounds = array<i64: 384, 48>}, {pipeline_mode = #tpu.pipeline_mode<synchronous>, transform_indices = @transform_10, window_bounds = array<i64: 1, 48>}, {pipeline_mode = #tpu.pipeline_mode<synchronous>, transform_indices = @transform_11, window_bounds = array<i64: 384, 16>}, {pipeline_mode = #tpu.pipeline_mode<synchronous>, transform_indices = @transform_12, window_bounds = array<i64: 1, 16>}, {transform_indices = @transform_13, window_bounds = array<i64: 32, 16>}]} {
    %cst = arith.constant 0.000000e+00 : f32
    %0 = vector.broadcast %cst : f32 to vector<32x384xf32>
    %c0 = arith.constant 0 : index
    %c0_0 = arith.constant 0 : index
    %1 = vector.load %arg15[%c0, %c0_0] : memref<32x384xf32, #tpu.memory_space<vmem>>, vector<32x384xf32>
    tpu.vector_store %arg15[%c0, %c0_0], %0 {strides = array<i32>} : memref<32x384xf32, #tpu.memory_space<vmem>>, vector<32x384xf32>,
    %c0_1 = arith.constant 0 : index
    %c0_2 = arith.constant 0 : index
    %2 = vector.load %arg1[%c0_1, %c0_2] : memref<32x16xf32, #tpu.memory_space<vmem>>, vector<32x16xf32>
    %3 = vector.extract_strided_slice %2 {offsets = [0, 0], sizes = [31, 16], strides = [1, 1]} : vector<32x16xf32> to vector<31x16xf32>
    %c1 = arith.constant 1 : index
    %c0_3 = arith.constant 0 : index
    %4 = vector.load %arg15[%c1, %c0_3] : memref<32x384xf32, #tpu.memory_space<vmem>>, vector<31x16xf32>
    tpu.vector_store %arg15[%c1, %c0_3], %3 {strides = array<i32>} : memref<32x384xf32, #tpu.memory_space<vmem>>, vector<31x16xf32>,
    %cst_4 = arith.constant 0.000000e+00 : f32
    %5 = vector.broadcast %cst_4 : f32 to vector<1x16xf32>
    %c0_5 = arith.constant 0 : index
    %c0_6 = arith.constant 0 : index
    %6 = vector.load %arg15[%c0_5, %c0_6] : memref<32x384xf32, #tpu.memory_space<vmem>>, vector<1x16xf32>
    tpu.vector_store %arg15[%c0_5, %c0_6], %5 {strides = array<i32>} : memref<32x384xf32, #tpu.memory_space<vmem>>, vector<1x16xf32>,
    %cst_7 = arith.constant 0.000000e+00 : f32
    %7 = vector.broadcast %cst_7 : f32 to vector<1x16xf32>
    %c16 = arith.constant 16 : index
    %c0_8 = arith.constant 0 : index
    %8 = vector.load %arg15[%c16, %c0_8] : memref<32x384xf32, #tpu.memory_space<vmem>>, vector<1x16xf32>
    tpu.vector_store %arg15[%c16, %c0_8], %7 {strides = array<i32>} : memref<32x384xf32, #tpu.memory_space<vmem>>, vector<1x16xf32>,
    %c0_9 = arith.constant 0 : index
    %c128 = arith.constant 128 : index
    %9 = vector.load %arg15[%c0_9, %c128] : memref<32x384xf32, #tpu.memory_space<vmem>>, vector<32x16xf32>
    tpu.vector_store %arg15[%c0_9, %c128], %2 {strides = array<i32>} : memref<32x384xf32, #tpu.memory_space<vmem>>, vector<32x16xf32>,
    %10 = vector.extract_strided_slice %2 {offsets = [1, 0], sizes = [31, 16], strides = [1, 1]} : vector<32x16xf32> to vector<31x16xf32>
    %c0_10 = arith.constant 0 : index
    %c256 = arith.constant 256 : index
    %11 = vector.load %arg15[%c0_10, %c256] : memref<32x384xf32, #tpu.memory_space<vmem>>, vector<31x16xf32>
    tpu.vector_store %arg15[%c0_10, %c256], %10 {strides = array<i32>} : memref<32x384xf32, #tpu.memory_space<vmem>>, vector<31x16xf32>,
    %cst_11 = arith.constant 0.000000e+00 : f32
    %12 = vector.broadcast %cst_11 : f32 to vector<1x16xf32>
    %c15 = arith.constant 15 : index
    %c256_12 = arith.constant 256 : index
    %13 = vector.load %arg15[%c15, %c256_12] : memref<32x384xf32, #tpu.memory_space<vmem>>, vector<1x16xf32>
    tpu.vector_store %arg15[%c15, %c256_12], %12 {strides = array<i32>} : memref<32x384xf32, #tpu.memory_space<vmem>>, vector<1x16xf32>,
    %cst_13 = arith.constant 0.000000e+00 : f32
    %14 = vector.broadcast %cst_13 : f32 to vector<1x16xf32>
    %c31 = arith.constant 31 : index
    %c256_14 = arith.constant 256 : index
    %15 = vector.load %arg15[%c31, %c256_14] : memref<32x384xf32, #tpu.memory_space<vmem>>, vector<1x16xf32>
    tpu.vector_store %arg15[%c31, %c256_14], %14 {strides = array<i32>} : memref<32x384xf32, #tpu.memory_space<vmem>>, vector<1x16xf32>,
    %c0_15 = arith.constant 0 : index
    %c0_16 = arith.constant 0 : index
    %16 = vector.load %arg15[%c0_15, %c0_16] : memref<32x384xf32, #tpu.memory_space<vmem>>, vector<32x384xf32>
    %c0_17 = arith.constant 0 : index
    %c0_18 = arith.constant 0 : index
    %17 = vector.load %arg2[%c0_17, %c0_18] : memref<384x64xf32, #tpu.memory_space<vmem>>, vector<384x64xf32>
    %cst_19 = arith.constant dense<0.000000e+00> : vector<32x64xf32>
    %18 = tpu.matmul %16, %17, %cst_19 {dimension_numbers = #tpu.dot_dimension_numbers<[1], [0], [0], [1], [0, 0, 1, 1], [], []>} : vector<32x384xf32>, vector<384x64xf32>, vector<32x64xf32> -> vector<32x64xf32>
    %c0_20 = arith.constant 0 : index
    %c0_21 = arith.constant 0 : index
    %19 = vector.load %arg3[%c0_20, %c0_21] : memref<1x64xf32, #tpu.memory_space<vmem>>, vector<1x64xf32>
    %20 = vector.broadcast %19 : vector<1x64xf32> to vector<32x64xf32>
    %21 = arith.addf %18, %20 : vector<32x64xf32>
    %cst_22 = arith.constant 1.000000e-01 : f32
    %22 = vector.broadcast %cst_22 : f32 to vector<32x64xf32>
    %23 = arith.mulf %22, %21 : vector<32x64xf32>
    %24 = arith.maximumf %21, %23 : vector<32x64xf32>
    %25 = vector.extract_strided_slice %24 {offsets = [0, 0], sizes = [31, 64], strides = [1, 1]} : vector<32x64xf32> to vector<31x64xf32>
    %c1_23 = arith.constant 1 : index
    %c0_24 = arith.constant 0 : index
    %26 = vector.load %arg15[%c1_23, %c0_24] : memref<32x384xf32, #tpu.memory_space<vmem>>, vector<31x64xf32>
    tpu.vector_store %arg15[%c1_23, %c0_24], %25 {strides = array<i32>} : memref<32x384xf32, #tpu.memory_space<vmem>>, vector<31x64xf32>,
    %cst_25 = arith.constant 0.000000e+00 : f32
    %27 = vector.broadcast %cst_25 : f32 to vector<1x64xf32>
    %c0_26 = arith.constant 0 : index
    %c0_27 = arith.constant 0 : index
    %28 = vector.load %arg15[%c0_26, %c0_27] : memref<32x384xf32, #tpu.memory_space<vmem>>, vector<1x64xf32>
    tpu.vector_store %arg15[%c0_26, %c0_27], %27 {strides = array<i32>} : memref<32x384xf32, #tpu.memory_space<vmem>>, vector<1x64xf32>,
    %cst_28 = arith.constant 0.000000e+00 : f32
    %29 = vector.broadcast %cst_28 : f32 to vector<1x64xf32>
    %c16_29 = arith.constant 16 : index
    %c0_30 = arith.constant 0 : index
    %30 = vector.load %arg15[%c16_29, %c0_30] : memref<32x384xf32, #tpu.memory_space<vmem>>, vector<1x64xf32>
    tpu.vector_store %arg15[%c16_29, %c0_30], %29 {strides = array<i32>} : memref<32x384xf32, #tpu.memory_space<vmem>>, vector<1x64xf32>,
    %c0_31 = arith.constant 0 : index
    %c128_32 = arith.constant 128 : index
    %31 = vector.load %arg15[%c0_31, %c128_32] : memref<32x384xf32, #tpu.memory_space<vmem>>, vector<32x64xf32>
    tpu.vector_store %arg15[%c0_31, %c128_32], %24 {strides = array<i32>} : memref<32x384xf32, #tpu.memory_space<vmem>>, vector<32x64xf32>,
    %32 = vector.extract_strided_slice %24 {offsets = [1, 0], sizes = [31, 64], strides = [1, 1]} : vector<32x64xf32> to vector<31x64xf32>
    %c0_33 = arith.constant 0 : index
    %c256_34 = arith.constant 256 : index
    %33 = vector.load %arg15[%c0_33, %c256_34] : memref<32x384xf32, #tpu.memory_space<vmem>>, vector<31x64xf32>
    tpu.vector_store %arg15[%c0_33, %c256_34], %32 {strides = array<i32>} : memref<32x384xf32, #tpu.memory_space<vmem>>, vector<31x64xf32>,
    %cst_35 = arith.constant 0.000000e+00 : f32
    %34 = vector.broadcast %cst_35 : f32 to vector<1x64xf32>
    %c15_36 = arith.constant 15 : index
    %c256_37 = arith.constant 256 : index
    %35 = vector.load %arg15[%c15_36, %c256_37] : memref<32x384xf32, #tpu.memory_space<vmem>>, vector<1x64xf32>
    tpu.vector_store %arg15[%c15_36, %c256_37], %34 {strides = array<i32>} : memref<32x384xf32, #tpu.memory_space<vmem>>, vector<1x64xf32>,
    %cst_38 = arith.constant 0.000000e+00 : f32
    %36 = vector.broadcast %cst_38 : f32 to vector<1x64xf32>
    %c31_39 = arith.constant 31 : index
    %c256_40 = arith.constant 256 : index
    %37 = vector.load %arg15[%c31_39, %c256_40] : memref<32x384xf32, #tpu.memory_space<vmem>>, vector<1x64xf32>
    tpu.vector_store %arg15[%c31_39, %c256_40], %36 {strides = array<i32>} : memref<32x384xf32, #tpu.memory_space<vmem>>, vector<1x64xf32>,
    %c0_41 = arith.constant 0 : index
    %c0_42 = arith.constant 0 : index
    %38 = vector.load %arg15[%c0_41, %c0_42] : memref<32x384xf32, #tpu.memory_space<vmem>>, vector<32x384xf32>
    %c0_43 = arith.constant 0 : index
    %c0_44 = arith.constant 0 : index
    %39 = vector.load %arg4[%c0_43, %c0_44] : memref<384x64xf32, #tpu.memory_space<vmem>>, vector<384x64xf32>
    %cst_45 = arith.constant dense<0.000000e+00> : vector<32x64xf32>
    %40 = tpu.matmul %38, %39, %cst_45 {dimension_numbers = #tpu.dot_dimension_numbers<[1], [0], [0], [1], [0, 0, 1, 1], [], []>} : vector<32x384xf32>, vector<384x64xf32>, vector<32x64xf32> -> vector<32x64xf32>
    %c0_46 = arith.constant 0 : index
    %c0_47 = arith.constant 0 : index
    %41 = vector.load %arg5[%c0_46, %c0_47] : memref<1x64xf32, #tpu.memory_space<vmem>>, vector<1x64xf32>
    %42 = vector.broadcast %41 : vector<1x64xf32> to vector<32x64xf32>
    %43 = arith.addf %40, %42 : vector<32x64xf32>
    %cst_48 = arith.constant 1.000000e-01 : f32
    %44 = vector.broadcast %cst_48 : f32 to vector<32x64xf32>
    %45 = arith.mulf %44, %43 : vector<32x64xf32>
    %46 = arith.maximumf %43, %45 : vector<32x64xf32>
    %47 = vector.extract_strided_slice %46 {offsets = [0, 0], sizes = [31, 64], strides = [1, 1]} : vector<32x64xf32> to vector<31x64xf32>
    %c1_49 = arith.constant 1 : index
    %c0_50 = arith.constant 0 : index
    %48 = vector.load %arg15[%c1_49, %c0_50] : memref<32x384xf32, #tpu.memory_space<vmem>>, vector<31x64xf32>
    tpu.vector_store %arg15[%c1_49, %c0_50], %47 {strides = array<i32>} : memref<32x384xf32, #tpu.memory_space<vmem>>, vector<31x64xf32>,
    %cst_51 = arith.constant 0.000000e+00 : f32
    %49 = vector.broadcast %cst_51 : f32 to vector<1x64xf32>
    %c0_52 = arith.constant 0 : index
    %c0_53 = arith.constant 0 : index
    %50 = vector.load %arg15[%c0_52, %c0_53] : memref<32x384xf32, #tpu.memory_space<vmem>>, vector<1x64xf32>
    tpu.vector_store %arg15[%c0_52, %c0_53], %49 {strides = array<i32>} : memref<32x384xf32, #tpu.memory_space<vmem>>, vector<1x64xf32>,
    %cst_54 = arith.constant 0.000000e+00 : f32
    %51 = vector.broadcast %cst_54 : f32 to vector<1x64xf32>
    %c16_55 = arith.constant 16 : index
    %c0_56 = arith.constant 0 : index
    %52 = vector.load %arg15[%c16_55, %c0_56] : memref<32x384xf32, #tpu.memory_space<vmem>>, vector<1x64xf32>
    tpu.vector_store %arg15[%c16_55, %c0_56], %51 {strides = array<i32>} : memref<32x384xf32, #tpu.memory_space<vmem>>, vector<1x64xf32>,
    %c0_57 = arith.constant 0 : index
    %c128_58 = arith.constant 128 : index
    %53 = vector.load %arg15[%c0_57, %c128_58] : memref<32x384xf32, #tpu.memory_space<vmem>>, vector<32x64xf32>
    tpu.vector_store %arg15[%c0_57, %c128_58], %46 {strides = array<i32>} : memref<32x384xf32, #tpu.memory_space<vmem>>, vector<32x64xf32>,
    %54 = vector.extract_strided_slice %46 {offsets = [1, 0], sizes = [31, 64], strides = [1, 1]} : vector<32x64xf32> to vector<31x64xf32>
    %c0_59 = arith.constant 0 : index
    %c256_60 = arith.constant 256 : index
    %55 = vector.load %arg15[%c0_59, %c256_60] : memref<32x384xf32, #tpu.memory_space<vmem>>, vector<31x64xf32>
    tpu.vector_store %arg15[%c0_59, %c256_60], %54 {strides = array<i32>} : memref<32x384xf32, #tpu.memory_space<vmem>>, vector<31x64xf32>,
    %cst_61 = arith.constant 0.000000e+00 : f32
    %56 = vector.broadcast %cst_61 : f32 to vector<1x64xf32>
    %c15_62 = arith.constant 15 : index
    %c256_63 = arith.constant 256 : index
    %57 = vector.load %arg15[%c15_62, %c256_63] : memref<32x384xf32, #tpu.memory_space<vmem>>, vector<1x64xf32>
    tpu.vector_store %arg15[%c15_62, %c256_63], %56 {strides = array<i32>} : memref<32x384xf32, #tpu.memory_space<vmem>>, vector<1x64xf32>,
    %cst_64 = arith.constant 0.000000e+00 : f32
    %58 = vector.broadcast %cst_64 : f32 to vector<1x64xf32>
    %c31_65 = arith.constant 31 : index
    %c256_66 = arith.constant 256 : index
    %59 = vector.load %arg15[%c31_65, %c256_66] : memref<32x384xf32, #tpu.memory_space<vmem>>, vector<1x64xf32>
    tpu.vector_store %arg15[%c31_65, %c256_66], %58 {strides = array<i32>} : memref<32x384xf32, #tpu.memory_space<vmem>>, vector<1x64xf32>,
    %c0_67 = arith.constant 0 : index
    %c0_68 = arith.constant 0 : index
    %60 = vector.load %arg15[%c0_67, %c0_68] : memref<32x384xf32, #tpu.memory_space<vmem>>, vector<32x384xf32>
    %c0_69 = arith.constant 0 : index
    %c0_70 = arith.constant 0 : index
    %61 = vector.load %arg6[%c0_69, %c0_70] : memref<384x24xf32, #tpu.memory_space<vmem>>, vector<384x24xf32>
    %cst_71 = arith.constant dense<0.000000e+00> : vector<32x24xf32>
    %62 = tpu.matmul %60, %61, %cst_71 {dimension_numbers = #tpu.dot_dimension_numbers<[1], [0], [0], [1], [0, 0, 1, 1], [], []>} : vector<32x384xf32>, vector<384x24xf32>, vector<32x24xf32> -> vector<32x24xf32>
    %c0_72 = arith.constant 0 : index
    %c0_73 = arith.constant 0 : index
    %63 = vector.load %arg7[%c0_72, %c0_73] : memref<1x24xf32, #tpu.memory_space<vmem>>, vector<1x24xf32>
    %64 = vector.broadcast %63 : vector<1x24xf32> to vector<32x24xf32>
    %65 = arith.addf %62, %64 : vector<32x24xf32>
    %cst_74 = arith.constant 1.000000e-01 : f32
    %66 = vector.broadcast %cst_74 : f32 to vector<32x24xf32>
    %67 = arith.mulf %66, %65 : vector<32x24xf32>
    %68 = arith.maximumf %65, %67 : vector<32x24xf32>
    %69 = vector.extract_strided_slice %68 {offsets = [0, 0], sizes = [31, 24], strides = [1, 1]} : vector<32x24xf32> to vector<31x24xf32>
    %c1_75 = arith.constant 1 : index
    %c0_76 = arith.constant 0 : index
    %70 = vector.load %arg15[%c1_75, %c0_76] : memref<32x384xf32, #tpu.memory_space<vmem>>, vector<31x24xf32>
    tpu.vector_store %arg15[%c1_75, %c0_76], %69 {strides = array<i32>} : memref<32x384xf32, #tpu.memory_space<vmem>>, vector<31x24xf32>,
    %cst_77 = arith.constant 0.000000e+00 : f32
    %71 = vector.broadcast %cst_77 : f32 to vector<1x24xf32>
    %c0_78 = arith.constant 0 : index
    %c0_79 = arith.constant 0 : index
    %72 = vector.load %arg15[%c0_78, %c0_79] : memref<32x384xf32, #tpu.memory_space<vmem>>, vector<1x24xf32>
    tpu.vector_store %arg15[%c0_78, %c0_79], %71 {strides = array<i32>} : memref<32x384xf32, #tpu.memory_space<vmem>>, vector<1x24xf32>,
    %cst_80 = arith.constant 0.000000e+00 : f32
    %73 = vector.broadcast %cst_80 : f32 to vector<1x24xf32>
    %c16_81 = arith.constant 16 : index
    %c0_82 = arith.constant 0 : index
    %74 = vector.load %arg15[%c16_81, %c0_82] : memref<32x384xf32, #tpu.memory_space<vmem>>, vector<1x24xf32>
    tpu.vector_store %arg15[%c16_81, %c0_82], %73 {strides = array<i32>} : memref<32x384xf32, #tpu.memory_space<vmem>>, vector<1x24xf32>,
    %c0_83 = arith.constant 0 : index
    %c128_84 = arith.constant 128 : index
    %75 = vector.load %arg15[%c0_83, %c128_84] : memref<32x384xf32, #tpu.memory_space<vmem>>, vector<32x24xf32>
    tpu.vector_store %arg15[%c0_83, %c128_84], %68 {strides = array<i32>} : memref<32x384xf32, #tpu.memory_space<vmem>>, vector<32x24xf32>,
    %76 = vector.extract_strided_slice %68 {offsets = [1, 0], sizes = [31, 24], strides = [1, 1]} : vector<32x24xf32> to vector<31x24xf32>
    %c0_85 = arith.constant 0 : index
    %c256_86 = arith.constant 256 : index
    %77 = vector.load %arg15[%c0_85, %c256_86] : memref<32x384xf32, #tpu.memory_space<vmem>>, vector<31x24xf32>
    tpu.vector_store %arg15[%c0_85, %c256_86], %76 {strides = array<i32>} : memref<32x384xf32, #tpu.memory_space<vmem>>, vector<31x24xf32>,
    %cst_87 = arith.constant 0.000000e+00 : f32
    %78 = vector.broadcast %cst_87 : f32 to vector<1x24xf32>
    %c15_88 = arith.constant 15 : index
    %c256_89 = arith.constant 256 : index
    %79 = vector.load %arg15[%c15_88, %c256_89] : memref<32x384xf32, #tpu.memory_space<vmem>>, vector<1x24xf32>
    tpu.vector_store %arg15[%c15_88, %c256_89], %78 {strides = array<i32>} : memref<32x384xf32, #tpu.memory_space<vmem>>, vector<1x24xf32>,
    %cst_90 = arith.constant 0.000000e+00 : f32
    %80 = vector.broadcast %cst_90 : f32 to vector<1x24xf32>
    %c31_91 = arith.constant 31 : index
    %c256_92 = arith.constant 256 : index
    %81 = vector.load %arg15[%c31_91, %c256_92] : memref<32x384xf32, #tpu.memory_space<vmem>>, vector<1x24xf32>
    tpu.vector_store %arg15[%c31_91, %c256_92], %80 {strides = array<i32>} : memref<32x384xf32, #tpu.memory_space<vmem>>, vector<1x24xf32>,
    %c0_93 = arith.constant 0 : index
    %c0_94 = arith.constant 0 : index
    %82 = vector.load %arg15[%c0_93, %c0_94] : memref<32x384xf32, #tpu.memory_space<vmem>>, vector<32x384xf32>
    %c0_95 = arith.constant 0 : index
    %c0_96 = arith.constant 0 : index
    %83 = vector.load %arg8[%c0_95, %c0_96] : memref<384x48xf32, #tpu.memory_space<vmem>>, vector<384x48xf32>
    %cst_97 = arith.constant dense<0.000000e+00> : vector<32x48xf32>
    %84 = tpu.matmul %82, %83, %cst_97 {dimension_numbers = #tpu.dot_dimension_numbers<[1], [0], [0], [1], [0, 0, 1, 1], [], []>} : vector<32x384xf32>, vector<384x48xf32>, vector<32x48xf32> -> vector<32x48xf32>
    %c0_98 = arith.constant 0 : index
    %c0_99 = arith.constant 0 : index
    %85 = vector.load %arg9[%c0_98, %c0_99] : memref<1x48xf32, #tpu.memory_space<vmem>>, vector<1x48xf32>
    %86 = vector.broadcast %85 : vector<1x48xf32> to vector<32x48xf32>
    %87 = arith.addf %84, %86 : vector<32x48xf32>
    %cst_100 = arith.constant 1.000000e-01 : f32
    %88 = vector.broadcast %cst_100 : f32 to vector<32x48xf32>
    %89 = arith.mulf %88, %87 : vector<32x48xf32>
    %90 = arith.maximumf %87, %89 : vector<32x48xf32>
    %91 = vector.extract_strided_slice %90 {offsets = [0, 0], sizes = [31, 48], strides = [1, 1]} : vector<32x48xf32> to vector<31x48xf32>
    %c1_101 = arith.constant 1 : index
    %c0_102 = arith.constant 0 : index
    %92 = vector.load %arg15[%c1_101, %c0_102] : memref<32x384xf32, #tpu.memory_space<vmem>>, vector<31x48xf32>
    tpu.vector_store %arg15[%c1_101, %c0_102], %91 {strides = array<i32>} : memref<32x384xf32, #tpu.memory_space<vmem>>, vector<31x48xf32>,
    %cst_103 = arith.constant 0.000000e+00 : f32
    %93 = vector.broadcast %cst_103 : f32 to vector<1x48xf32>
    %c0_104 = arith.constant 0 : index
    %c0_105 = arith.constant 0 : index
    %94 = vector.load %arg15[%c0_104, %c0_105] : memref<32x384xf32, #tpu.memory_space<vmem>>, vector<1x48xf32>
    tpu.vector_store %arg15[%c0_104, %c0_105], %93 {strides = array<i32>} : memref<32x384xf32, #tpu.memory_space<vmem>>, vector<1x48xf32>,
    %cst_106 = arith.constant 0.000000e+00 : f32
    %95 = vector.broadcast %cst_106 : f32 to vector<1x48xf32>
    %c16_107 = arith.constant 16 : index
    %c0_108 = arith.constant 0 : index
    %96 = vector.load %arg15[%c16_107, %c0_108] : memref<32x384xf32, #tpu.memory_space<vmem>>, vector<1x48xf32>
    tpu.vector_store %arg15[%c16_107, %c0_108], %95 {strides = array<i32>} : memref<32x384xf32, #tpu.memory_space<vmem>>, vector<1x48xf32>,
    %c0_109 = arith.constant 0 : index
    %c128_110 = arith.constant 128 : index
    %97 = vector.load %arg15[%c0_109, %c128_110] : memref<32x384xf32, #tpu.memory_space<vmem>>, vector<32x48xf32>
    tpu.vector_store %arg15[%c0_109, %c128_110], %90 {strides = array<i32>} : memref<32x384xf32, #tpu.memory_space<vmem>>, vector<32x48xf32>,
    %98 = vector.extract_strided_slice %90 {offsets = [1, 0], sizes = [31, 48], strides = [1, 1]} : vector<32x48xf32> to vector<31x48xf32>
    %c0_111 = arith.constant 0 : index
    %c256_112 = arith.constant 256 : index
    %99 = vector.load %arg15[%c0_111, %c256_112] : memref<32x384xf32, #tpu.memory_space<vmem>>, vector<31x48xf32>
    tpu.vector_store %arg15[%c0_111, %c256_112], %98 {strides = array<i32>} : memref<32x384xf32, #tpu.memory_space<vmem>>, vector<31x48xf32>,
    %cst_113 = arith.constant 0.000000e+00 : f32
    %100 = vector.broadcast %cst_113 : f32 to vector<1x48xf32>
    %c15_114 = arith.constant 15 : index
    %c256_115 = arith.constant 256 : index
    %101 = vector.load %arg15[%c15_114, %c256_115] : memref<32x384xf32, #tpu.memory_space<vmem>>, vector<1x48xf32>
    tpu.vector_store %arg15[%c15_114, %c256_115], %100 {strides = array<i32>} : memref<32x384xf32, #tpu.memory_space<vmem>>, vector<1x48xf32>,
    %cst_116 = arith.constant 0.000000e+00 : f32
    %102 = vector.broadcast %cst_116 : f32 to vector<1x48xf32>
    %c31_117 = arith.constant 31 : index
    %c256_118 = arith.constant 256 : index
    %103 = vector.load %arg15[%c31_117, %c256_118] : memref<32x384xf32, #tpu.memory_space<vmem>>, vector<1x48xf32>
    tpu.vector_store %arg15[%c31_117, %c256_118], %102 {strides = array<i32>} : memref<32x384xf32, #tpu.memory_space<vmem>>, vector<1x48xf32>,
    %c0_119 = arith.constant 0 : index
    %c0_120 = arith.constant 0 : index
    %104 = vector.load %arg15[%c0_119, %c0_120] : memref<32x384xf32, #tpu.memory_space<vmem>>, vector<32x384xf32>
    %c0_121 = arith.constant 0 : index
    %c0_122 = arith.constant 0 : index
    %105 = vector.load %arg10[%c0_121, %c0_122] : memref<384x48xf32, #tpu.memory_space<vmem>>, vector<384x48xf32>
    %cst_123 = arith.constant dense<0.000000e+00> : vector<32x48xf32>
    %106 = tpu.matmul %104, %105, %cst_123 {dimension_numbers = #tpu.dot_dimension_numbers<[1], [0], [0], [1], [0, 0, 1, 1], [], []>} : vector<32x384xf32>, vector<384x48xf32>, vector<32x48xf32> -> vector<32x48xf32>
    %c0_124 = arith.constant 0 : index
    %c0_125 = arith.constant 0 : index
    %107 = vector.load %arg11[%c0_124, %c0_125] : memref<1x48xf32, #tpu.memory_space<vmem>>, vector<1x48xf32>
    %108 = vector.broadcast %107 : vector<1x48xf32> to vector<32x48xf32>
    %109 = arith.addf %106, %108 : vector<32x48xf32>
    %cst_126 = arith.constant 1.000000e-01 : f32
    %110 = vector.broadcast %cst_126 : f32 to vector<32x48xf32>
    %111 = arith.mulf %110, %109 : vector<32x48xf32>
    %112 = arith.maximumf %109, %111 : vector<32x48xf32>
    %113 = vector.extract_strided_slice %112 {offsets = [0, 0], sizes = [31, 48], strides = [1, 1]} : vector<32x48xf32> to vector<31x48xf32>
    %c1_127 = arith.constant 1 : index
    %c0_128 = arith.constant 0 : index
    %114 = vector.load %arg15[%c1_127, %c0_128] : memref<32x384xf32, #tpu.memory_space<vmem>>, vector<31x48xf32>
    tpu.vector_store %arg15[%c1_127, %c0_128], %113 {strides = array<i32>} : memref<32x384xf32, #tpu.memory_space<vmem>>, vector<31x48xf32>,
    %cst_129 = arith.constant 0.000000e+00 : f32
    %115 = vector.broadcast %cst_129 : f32 to vector<1x48xf32>
    %c0_130 = arith.constant 0 : index
    %c0_131 = arith.constant 0 : index
    %116 = vector.load %arg15[%c0_130, %c0_131] : memref<32x384xf32, #tpu.memory_space<vmem>>, vector<1x48xf32>
    tpu.vector_store %arg15[%c0_130, %c0_131], %115 {strides = array<i32>} : memref<32x384xf32, #tpu.memory_space<vmem>>, vector<1x48xf32>,
    %cst_132 = arith.constant 0.000000e+00 : f32
    %117 = vector.broadcast %cst_132 : f32 to vector<1x48xf32>
    %c16_133 = arith.constant 16 : index
    %c0_134 = arith.constant 0 : index
    %118 = vector.load %arg15[%c16_133, %c0_134] : memref<32x384xf32, #tpu.memory_space<vmem>>, vector<1x48xf32>
    tpu.vector_store %arg15[%c16_133, %c0_134], %117 {strides = array<i32>} : memref<32x384xf32, #tpu.memory_space<vmem>>, vector<1x48xf32>,
    %c0_135 = arith.constant 0 : index
    %c128_136 = arith.constant 128 : index
    %119 = vector.load %arg15[%c0_135, %c128_136] : memref<32x384xf32, #tpu.memory_space<vmem>>, vector<32x48xf32>
    tpu.vector_store %arg15[%c0_135, %c128_136], %112 {strides = array<i32>} : memref<32x384xf32, #tpu.memory_space<vmem>>, vector<32x48xf32>,
    %120 = vector.extract_strided_slice %112 {offsets = [1, 0], sizes = [31, 48], strides = [1, 1]} : vector<32x48xf32> to vector<31x48xf32>
    %c0_137 = arith.constant 0 : index
    %c256_138 = arith.constant 256 : index
    %121 = vector.load %arg15[%c0_137, %c256_138] : memref<32x384xf32, #tpu.memory_space<vmem>>, vector<31x48xf32>
    tpu.vector_store %arg15[%c0_137, %c256_138], %120 {strides = array<i32>} : memref<32x384xf32, #tpu.memory_space<vmem>>, vector<31x48xf32>,
    %cst_139 = arith.constant 0.000000e+00 : f32
    %122 = vector.broadcast %cst_139 : f32 to vector<1x48xf32>
    %c15_140 = arith.constant 15 : index
    %c256_141 = arith.constant 256 : index
    %123 = vector.load %arg15[%c15_140, %c256_141] : memref<32x384xf32, #tpu.memory_space<vmem>>, vector<1x48xf32>
    tpu.vector_store %arg15[%c15_140, %c256_141], %122 {strides = array<i32>} : memref<32x384xf32, #tpu.memory_space<vmem>>, vector<1x48xf32>,
    %cst_142 = arith.constant 0.000000e+00 : f32
    %124 = vector.broadcast %cst_142 : f32 to vector<1x48xf32>
    %c31_143 = arith.constant 31 : index
    %c256_144 = arith.constant 256 : index
    %125 = vector.load %arg15[%c31_143, %c256_144] : memref<32x384xf32, #tpu.memory_space<vmem>>, vector<1x48xf32>
    tpu.vector_store %arg15[%c31_143, %c256_144], %124 {strides = array<i32>} : memref<32x384xf32, #tpu.memory_space<vmem>>, vector<1x48xf32>,
    %c0_145 = arith.constant 0 : index
    %c0_146 = arith.constant 0 : index
    %126 = vector.load %arg15[%c0_145, %c0_146] : memref<32x384xf32, #tpu.memory_space<vmem>>, vector<32x384xf32>
    %c0_147 = arith.constant 0 : index
    %c0_148 = arith.constant 0 : index
    %127 = vector.load %arg12[%c0_147, %c0_148] : memref<384x16xf32, #tpu.memory_space<vmem>>, vector<384x16xf32>
    %cst_149 = arith.constant dense<0.000000e+00> : vector<32x16xf32>
    %128 = tpu.matmul %126, %127, %cst_149 {dimension_numbers = #tpu.dot_dimension_numbers<[1], [0], [0], [1], [0, 0, 1, 1], [], []>} : vector<32x384xf32>, vector<384x16xf32>, vector<32x16xf32> -> vector<32x16xf32>
    %c0_150 = arith.constant 0 : index
    %c0_151 = arith.constant 0 : index
    %129 = vector.load %arg13[%c0_150, %c0_151] : memref<1x16xf32, #tpu.memory_space<vmem>>, vector<1x16xf32>
    %130 = vector.broadcast %129 : vector<1x16xf32> to vector<32x16xf32>
    %131 = arith.addf %128, %130 : vector<32x16xf32>
    %cst_152 = arith.constant 1.000000e-01 : f32
    %132 = vector.broadcast %cst_152 : f32 to vector<32x16xf32>
    %133 = arith.mulf %132, %131 : vector<32x16xf32>
    %134 = arith.maximumf %131, %133 : vector<32x16xf32>
    %c0_153 = arith.constant 0 : index
    %c0_154 = arith.constant 0 : index
    %135 = vector.load %arg14[%c0_153, %c0_154] : memref<32x16xf32, #tpu.memory_space<vmem>>, vector<32x16xf32>
    tpu.vector_store %arg14[%c0_153, %c0_154], %134 {strides = array<i32>} : memref<32x16xf32, #tpu.memory_space<vmem>>, vector<32x16xf32>,
    return
  }
  func.func @transform_0(%arg0: i32) -> (i32, i32) {
    %c0_i32 = arith.constant 0 : i32
    %c0_i32_0 = arith.constant 0 : i32
    return %arg0, %c0_i32 : i32, i32
  }
  func.func @transform_1(%arg0: i32) -> (i32, i32) {
    %c0_i32 = arith.constant 0 : i32
    %c0_i32_0 = arith.constant 0 : i32
    %c0_i32_1 = arith.constant 0 : i32
    return %c0_i32, %c0_i32_0 : i32, i32
  }
  func.func @transform_2(%arg0: i32) -> (i32, i32) {
    %c0_i32 = arith.constant 0 : i32
    %c0_i32_0 = arith.constant 0 : i32
    %c0_i32_1 = arith.constant 0 : i32
    return %c0_i32, %c0_i32_0 : i32, i32
  }
  func.func @transform_3(%arg0: i32) -> (i32, i32) {
    %c0_i32 = arith.constant 0 : i32
    %c0_i32_0 = arith.constant 0 : i32
    %c0_i32_1 = arith.constant 0 : i32
    return %c0_i32, %c0_i32_0 : i32, i32
  }
  func.func @transform_4(%arg0: i32) -> (i32, i32) {
    %c0_i32 = arith.constant 0 : i32
    %c0_i32_0 = arith.constant 0 : i32
    %c0_i32_1 = arith.constant 0 : i32
    return %c0_i32, %c0_i32_0 : i32, i32
  }
  func.func @transform_5(%arg0: i32) -> (i32, i32) {
    %c0_i32 = arith.constant 0 : i32
    %c0_i32_0 = arith.constant 0 : i32
    %c0_i32_1 = arith.constant 0 : i32
    return %c0_i32, %c0_i32_0 : i32, i32
  }
  func.func @transform_6(%arg0: i32) -> (i32, i32) {
    %c0_i32 = arith.constant 0 : i32
    %c0_i32_0 = arith.constant 0 : i32
    %c0_i32_1 = arith.constant 0 : i32
    return %c0_i32, %c0_i32_0 : i32, i32
  }
  func.func @transform_7(%arg0: i32) -> (i32, i32) {
    %c0_i32 = arith.constant 0 : i32
    %c0_i32_0 = arith.constant 0 : i32
    %c0_i32_1 = arith.constant 0 : i32
    return %c0_i32, %c0_i32_0 : i32, i32
  }
  func.func @transform_8(%arg0: i32) -> (i32, i32) {
    %c0_i32 = arith.constant 0 : i32
    %c0_i32_0 = arith.constant 0 : i32
    %c0_i32_1 = arith.constant 0 : i32
    return %c0_i32, %c0_i32_0 : i32, i32
  }
  func.func @transform_9(%arg0: i32) -> (i32, i32) {
    %c0_i32 = arith.constant 0 : i32
    %c0_i32_0 = arith.constant 0 : i32
    %c0_i32_1 = arith.constant 0 : i32
    return %c0_i32, %c0_i32_0 : i32, i32
  }
  func.func @transform_10(%arg0: i32) -> (i32, i32) {
    %c0_i32 = arith.constant 0 : i32
    %c0_i32_0 = arith.constant 0 : i32
    %c0_i32_1 = arith.constant 0 : i32
    return %c0_i32, %c0_i32_0 : i32, i32
  }
  func.func @transform_11(%arg0: i32) -> (i32, i32) {
    %c0_i32 = arith.constant 0 : i32
    %c0_i32_0 = arith.constant 0 : i32
    %c0_i32_1 = arith.constant 0 : i32
    return %c0_i32, %c0_i32_0 : i32, i32
  }
  func.func @transform_12(%arg0: i32) -> (i32, i32) {
    %c0_i32 = arith.constant 0 : i32
    %c0_i32_0 = arith.constant 0 : i32
    %c0_i32_1 = arith.constant 0 : i32
    return %c0_i32, %c0_i32_0 : i32, i32
  }
  func.func @transform_13(%arg0: i32) -> (i32, i32) {
    %c0_i32 = arith.constant 0 : i32
    %c0_i32_0 = arith.constant 0 : i32
    return %arg0, %c0_i32 : i32, i32
  }
}

</mosaic_0001>

<bundles_post_ra>
// kernel: forward.1
= control target key start
LH: loop header
LB: loop body
LE: loop exit
PB: predicated region body
PF: predicated region fallthrough
CT: control target
= control target key end

     0   :  { %vm82_vm0 = vcmask 122880   ;;  %v2811_v3 = vmov 0.0   ;;  %vm78_vm1 = vcmask 130048   ;;  %vm76_vm2 = vcmask 130049   ;;  %s3958_s1 = inlined_call_operand.vmem [shape: f32[384,64], index: 1, kind: input, shape index: {}]   ;;  %s3959_s0 = inlined_call_operand.vmem [shape: f32[32,16], index: 0, kind: input, shape index: {}]   ;;  %s3960_s3 = inlined_call_operand.vmem [shape: f32[384,64], index: 3, kind: input, shape index: {}]   ;;  %s3961_s5 = inlined_call_operand.vmem [shape: f32[384,24], index: 5, kind: input, shape index: {}]   ;;  %s3962_s2 = inlined_call_operand.vmem [shape: f32[1,64], index: 2, kind: input, shape index: {}]   ;;  %s3963_s7 = inlined_call_operand.vmem [shape: f32[384,48], index: 7, kind: input, shape index: {}]   ;;  %s3964_s4 = inlined_call_operand.vmem [shape: f32[1,64], index: 4, kind: input, shape index: {}]   ;;  %s3965_s9 = inlined_call_operand.vmem [shape: f32[384,48], index: 9, kind: input, shape index: {}]   ;;  %s3966_s6 = inlined_call_operand.vmem [shape: f32[1,24], index: 6, kind: input, shape index: {}]   ;;  %s3967_s11 = inlined_call_operand.vmem [shape: f32[384,16], index: 11, kind: input, shape index: {}]   ;;  %s3968_s8 = inlined_call_operand.vmem [shape: f32[1,48], index: 8, kind: input, shape index: {}]   ;;  %s3969_s10 = inlined_call_operand.vmem [shape: f32[1,48], index: 10, kind: input, shape index: {}]   ;;  %s3970_s12 = inlined_call_operand.vmem [shape: f32[1,16], index: 12, kind: input, shape index: {}]   ;;  %s3971_s13 = inlined_call_operand.vmem [shape: f32[32,16], index: 13, kind: output, shape index: {}]  }
   0x1   :  { %v136_v0 = vld [vmem:[%s3958_s1 + $0x80] sm:$0xff]  ;;  %v137_v1 = vld [vmem:[%s3958_s1 + $0x88] sm:$0xff]  ;;  %44 = vst [vmem:[#allocation2] sm:$0xff] %v2811_v3  ;;  %45 = vst [vmem:[#allocation2 + $0x8] sm:$0xff] %v2811_v3  ;;  %vm89_vm3 = vcmask 1046528   ;;  %vm64_vm4 = vcmask 1040384  }
   0x2   :  { %v120_v2 = vld [vmem:[%s3958_s1] sm:$0xff]  ;;  %46 = vst [vmem:[#allocation2 + $0x10] sm:$0xff] %v2811_v3  ;;  %47 = vst [vmem:[#allocation2 + $0x18] sm:$0xff] %v2811_v3  ;;  %v2426_v4 = vpack.c.bf16 %v137_v1, %v136_v0  ;;  %v121_v5 = vld [vmem:[%s3958_s1 + $0x8] sm:$0xff]  ;;  %vm104_vm5 = vcmask 129024   ;;  %vm374_vm6 = vcmask 516096  }
   0x3   :  { %48 = vst [vmem:[#allocation2 + $0x20] sm:$0xff] %v2811_v3  ;;  %49 = vst [vmem:[#allocation2 + $0x28] sm:$0xff] %v2811_v3  ;;  %v138_v6 = vld [vmem:[%s3958_s1 + $0x90] sm:$0xff]  ;;  %v139_v7 = vld [vmem:[%s3958_s1 + $0x98] sm:$0xff]  ;;  %v2428_v8 = vpack.c.bf16 %v121_v5, %v120_v2  ;;  %vm370_vm7 = vcmask 523264   ;;  %vm368_vm8 = vcmask 523265  }
   0x4   :  { %50 = vst [vmem:[#allocation2 + $0x30] sm:$0xff] %v2811_v3  ;;  %51 = vst [vmem:[#allocation2 + $0x38] sm:$0xff] %v2811_v3  ;;  %v2430_v9 = vpack.c.bf16 %v139_v7, %v138_v6  ;;  %v152_v10 = vld [vmem:[%s3958_s1 + $0x100] sm:$0xff]  ;;  %v153_v11 = vld [vmem:[%s3958_s1 + $0x108] sm:$0xff]  ;;  %2427 = vmatprep.subr.bf16.mxu0 %v2426_v4  ;;  %vm395_vm9 = vcmask 522240   ;;  %vm952_vm10 = vcmask 188416  }
   0x5   :  { %52 = vst [vmem:[#allocation2 + $0x40] sm:$0xff] %v2811_v3  ;;  %53 = vst [vmem:[#allocation2 + $0x48] sm:$0xff] %v2811_v3  ;;  %v122_v12 = vld [vmem:[%s3958_s1 + $0x10] sm:$0xff]  ;;  %v2458_v13 = vpack.c.bf16 %v153_v11, %v152_v10  ;;  %v123_v14 = vld [vmem:[%s3958_s1 + $0x18] sm:$0xff]  ;;  %2429 = vmatpush3.bf16.msra.mxu0 %v2428_v8  ;;  %vm948_vm11 = vcmask 195584   ;;  %vm946_vm12 = vcmask 195585  }
   0x6   :  { %54 = vst [vmem:[#allocation2 + $0x50] sm:$0xff] %v2811_v3  ;;  %55 = vst [vmem:[#allocation2 + $0x58] sm:$0xff] %v2811_v3  ;;  %v140_v15 = vld [vmem:[%s3958_s1 + $0xa0] sm:$0xff]  ;;  %v141_v16 = vld [vmem:[%s3958_s1 + $0xa8] sm:$0xff]  ;;  %v2432_v17 = vpack.c.bf16 %v123_v14, %v122_v12  ;;  %2431 = vmatprep.subr.bf16.mxu0 %v2430_v9  ;;  %vm1243_vm13 = vcmask 385024   ;;  %vm973_vm14 = vcmask 194560  }
   0x7   :  { %83 = vst.msk [vmem:[#allocation2] sm:$0x1] %vm82_vm0, %v2811_v3  ;;  %107 = vst.msk [vmem:[#allocation2 + $0x5f] sm:$0x1] %vm82_vm0, %v2811_v3  ;;  %v154_v18 = vld [vmem:[%s3958_s1 + $0x110] sm:$0xff]  ;;  %v155_v19 = vld [vmem:[%s3958_s1 + $0x118] sm:$0xff]  ;;  %2459 = vmatprep.subr.bf16.mxu1 %v2458_v13  ;;  %v2434_v20 = vpack.c.bf16 %v141_v16, %v140_v15 }
   0x8   :  { %v2462_v21 = vpack.c.bf16 %v155_v19, %v154_v18  ;;  %v124_v22 = vld [vmem:[%s3958_s1 + $0x20] sm:$0xff]  ;;  %v125_v23 = vld [vmem:[%s3958_s1 + $0x28] sm:$0xff]  ;;  %v142_v24 = vld [vmem:[%s3958_s1 + $0xb0] sm:$0xff]  ;;  %2461 = vmatpush3.bf16.msra.mxu1 %v2458_v13  ;;  %vm1239_vm15 = vcmask 392192  }
   0x9   :  { %v143_v25 = vld [vmem:[%s3958_s1 + $0xb8] sm:$0xff]  ;;  %v156_v26 = vld [vmem:[%s3958_s1 + $0x120] sm:$0xff]  ;;  %v157_v27 = vld [vmem:[%s3958_s1 + $0x128] sm:$0xff]  ;;  %2433 = vmatpush3.bf16.msra.mxu0 %v2432_v17  ;;  %v2436_v29 = vpack.c.bf16 %v125_v23, %v124_v22 }
   0xa   :  { %2463 = vmatprep.subr.bf16.mxu1 %v2462_v21  ;;  %v2466_v28 = vpack.c.bf16 %v157_v27, %v156_v26  ;;  %v158_v30 = vld [vmem:[%s3958_s1 + $0x130] sm:$0xff]  ;;  %v159_v31 = vld [vmem:[%s3958_s1 + $0x138] sm:$0xff]  ;;  %2435 = vmatprep.subr.bf16.mxu0 %v2434_v20  ;;  %v2438_v32 = vpack.c.bf16 %v143_v25, %v142_v24  ;;  %v144_v35 = vld [vmem:[%s3958_s1 + $0xc0] sm:$0xff] }
   0xb   :  { %v126_v33 = vld [vmem:[%s3958_s1 + $0x30] sm:$0xff]  ;;  %v127_v34 = vld [vmem:[%s3958_s1 + $0x38] sm:$0xff]  ;;  %v145_v36 = vld [vmem:[%s3958_s1 + $0xc8] sm:$0xff]  ;;  %v2470_v37 = vpack.c.bf16 %v159_v31, %v158_v30 }
   0xc   :  { %2465 = vmatpush3.bf16.msra.mxu1 %v2462_v21  ;;  %v2440_v38 = vpack.c.bf16 %v127_v34, %v126_v33  ;;  %v160_v39 = vld [vmem:[%s3958_s1 + $0x140] sm:$0xff]  ;;  %v161_v40 = vld [vmem:[%s3958_s1 + $0x148] sm:$0xff]  ;;  %v2442_v41 = vpack.c.bf16 %v145_v36, %v144_v35  ;;  %v146_v44 = vld [vmem:[%s3958_s1 + $0xd0] sm:$0xff] }
   0xd   :  { %2467 = vmatprep.subr.bf16.mxu1 %v2466_v28  ;;  %2437 = vmatpush3.bf16.msra.mxu0 %v2436_v29  ;;  %v128_v42 = vld [vmem:[%s3958_s1 + $0x40] sm:$0xff]  ;;  %v129_v43 = vld [vmem:[%s3958_s1 + $0x48] sm:$0xff]  ;;  %v147_v45 = vld [vmem:[%s3958_s1 + $0xd8] sm:$0xff]  ;;  %v2474_v46 = vpack.c.bf16 %v161_v40, %v160_v39 }
   0xe   :  { %2439 = vmatprep.subr.bf16.mxu0 %v2438_v32  ;;  %v162_v47 = vld [vmem:[%s3958_s1 + $0x150] sm:$0xff]  ;;  %v56_v48 = vld [vmem:[%s3959_s0] sm:$0xff]  ;;  %v2444_v49 = vpack.c.bf16 %v129_v43, %v128_v42  ;;  %v163_v50 = vld [vmem:[%s3958_s1 + $0x158] sm:$0xff]  ;;  %v2446_v55 = vpack.c.bf16 %v147_v45, %v146_v44 }
   0xf   :  { %v65_v51 = vrot.slane %v56_v48, 7  ;;  %85 = vst.msk [vmem:[#allocation2 + $0x8] sm:$0xff] %vm78_vm1, %v56_v48  ;;  %v90_v52 = vrot.slane %v56_v48, 1  ;;  %v57_v53 = vld [vmem:[%s3959_s0 + $0x8] sm:$0xff]  ;;  %v58_v54 = vld [vmem:[%s3959_s0 + $0x10] sm:$0xff]  ;;  %v131_v57 = vld [vmem:[%s3958_s1 + $0x58] sm:$0xff]  ;;  %v2478_v4 = vpack.c.bf16 %v163_v50, %v162_v47 }
  0x10   :  { %2469 = vmatpush3.bf16.msra.mxu1 %v2466_v28  ;;  %v130_v56 = vld [vmem:[%s3958_s1 + $0x50] sm:$0xff]  ;;  %v66_v58 = vrot.slane %v57_v53, 7  ;;  %86 = vst.msk [vmem:[#allocation2 + $0x20] sm:$0xff] %vm78_vm1, %v57_v53  ;;  %v91_v59 = vrot.slane %v57_v53, 1  ;;  %v93_v60 = vrot.slane %v58_v54, 1  ;;  %87 = vst.msk [vmem:[#allocation2 + $0x38] sm:$0xff] %vm78_vm1, %v58_v54 }
  0x11   :  { %2471 = vmatprep.subr.bf16.mxu1 %v2470_v37  ;;  %2441 = vmatpush3.bf16.msra.mxu0 %v2440_v38  ;;  %v59_v61 = vld [vmem:[%s3959_s0 + $0x18] sm:$0xff]  ;;  %v148_v62 = vld [vmem:[%s3958_s1 + $0xe0] sm:$0xff]  ;;  %v149_v63 = vld [vmem:[%s3958_s1 + $0xe8] sm:$0xff]  ;;  %77 = vst.msk [vmem:[#allocation2] sm:$0xfe] %vm76_vm2, %v65_v51  ;;  %v68_v0 = vrot.slane %v58_v54, 7  ;;  %v2448_v8 = vpack.c.bf16 %v131_v57, %v130_v56 }
  0x12   :  { %2443 = vmatprep.subr.bf16.mxu0 %v2442_v41  ;;  %v95_v1 = vrot.slane %v59_v61, 1  ;;  %88 = vst.msk [vmem:[#allocation2 + $0x50] sm:$0xff] %vm78_vm1, %v59_v61  ;;  %v70_v2 = vrot.slane %v59_v61, 7  ;;  %v92_v5 = vsel %vm89_vm3, %v90_v52, %v91_v59  ;;  %v67_v6 = vsel %vm64_vm4, %v65_v51, %v66_v58  ;;  %v164_v9 = vld [vmem:[%s3958_s1 + $0x160] sm:$0xff]  ;;  %v165_v10 = vld [vmem:[%s3958_s1 + $0x168] sm:$0xff]  ;;  %v150_v17 = vld [vmem:[%s3958_s1 + $0xf0] sm:$0xff] }
  0x13   :  { %v94_v7 = vsel %vm89_vm3, %v91_v59, %v93_v60  ;;  %101 = vst.msk [vmem:[#allocation2 + $0x10] sm:$0xff] %vm78_vm1, %v92_v5  ;;  %79 = vst.msk [vmem:[#allocation2 + $0x18] sm:$0xff] %vm78_vm1, %v67_v6  ;;  %v69_v11 = vsel %vm64_vm4, %v66_v58, %v68_v0  ;;  %v2450_v14 = vpack.c.bf16 %v149_v63, %v148_v62  ;;  %v132_v15 = vld [vmem:[%s3958_s1 + $0x60] sm:$0xff]  ;;  %v133_v16 = vld [vmem:[%s3958_s1 + $0x68] sm:$0xff]  ;;  %vm1264_vm2 = vcmask 391168  }
  0x14   :  { %2473 = vmatpush3.bf16.msra.mxu1 %v2470_v37  ;;  %102 = vst.msk [vmem:[#allocation2 + $0x28] sm:$0xff] %vm78_vm1, %v94_v7  ;;  %v96_v12 = vsel %vm89_vm3, %v93_v60, %v95_v1  ;;  %v71_v13 = vsel %vm64_vm4, %v68_v0, %v70_v2  ;;  %80 = vst.msk [vmem:[#allocation2 + $0x30] sm:$0xff] %vm78_vm1, %v69_v11  ;;  %v151_v18 = vld [vmem:[%s3958_s1 + $0xf8] sm:$0xff]  ;;  %v2482_v19 = vpack.c.bf16 %v165_v10, %v164_v9  ;;  %v166_v22 = vld [vmem:[%s3958_s1 + $0x170] sm:$0xff] }
  0x15   :  { %2475 = vmatprep.subr.bf16.mxu1 %v2474_v46  ;;  %2445 = vmatpush3.bf16.msra.mxu0 %v2444_v49  ;;  %105 = vst.msk [vmem:[#allocation2 + $0x58] sm:$0x7f] %vm104_vm5, %v95_v1  ;;  %v2452_v21 = vpack.c.bf16 %v133_v16, %v132_v15  ;;  %v167_v23 = vld [vmem:[%s3958_s1 + $0x178] sm:$0xff]  ;;  %v2454_v24 = vpack.c.bf16 %v151_v18, %v150_v17  ;;  %v134_v25 = vld [vmem:[%s3958_s1 + $0x70] sm:$0xff]  ;;  %v427_v27 = vld [vmem:[%s3960_s3 + $0x80] sm:$0xff] }
  0x16   :  { %2447 = vmatprep.subr.bf16.mxu0 %v2446_v55  ;;  %106 = vst.msk [vmem:[#allocation2 + $0x2f] sm:$0x1] %vm82_vm0, %v2811_v3  ;;  %84 = vst.msk [vmem:[#allocation2 + $0x30] sm:$0x1] %vm82_vm0, %v2811_v3  ;;  %v109_v20 = vld [vmem:[#allocation2 + $0x8] sm:$0xff]  ;;  %v135_v26 = vld [vmem:[%s3958_s1 + $0x78] sm:$0xff]  ;;  %v2486_v29 = vpack.c.bf16 %v167_v23, %v166_v22 }
  0x17   :  { %103 = vst.msk [vmem:[#allocation2 + $0x40] sm:$0xff] %vm78_vm1, %v96_v12  ;;  %81 = vst.msk [vmem:[#allocation2 + $0x48] sm:$0xff] %vm78_vm1, %v71_v13  ;;  %239 = vmatprep.mubr.f32.mxu0 %v109_v20  ;;  %v428_v28 = vld [vmem:[%s3960_s3 + $0x88] sm:$0xff]  ;;  %v2456_v31 = vpack.c.bf16 %v135_v26, %v134_v25  ;;  %v411_v33 = vld [vmem:[%s3960_s3] sm:$0xff]  ;;  %vm1237_vm0 = vcmask 392193  }
  0x18   :  { %2477 = vmatpush3.bf16.msra.mxu1 %v2474_v46  ;;  %v2490_v32 = vpack.c.bf16 %v428_v28, %v427_v27  ;;  %v412_v34 = vld [vmem:[%s3960_s3 + $0x8] sm:$0xff]  ;;  %v429_v35 = vld [vmem:[%s3960_s3 + $0x90] sm:$0xff]  ;;  %v430_v36 = vld [vmem:[%s3960_s3 + $0x98] sm:$0xff] }
  0x19   :  { %2479 = vmatprep.subr.bf16.mxu1 %v2478_v4  ;;  %2449 = vmatpush3.bf16.msra.mxu0 %v2448_v8  ;;  %v108_v37 = vld [vmem:[#allocation2] sm:$0xff]  ;;  %v2492_v38 = vpack.c.bf16 %v412_v34, %v411_v33  ;;  %v2494_v40 = vpack.c.bf16 %v430_v36, %v429_v35  ;;  %v413_v41 = vld [vmem:[%s3960_s3 + $0x10] sm:$0xff]  ;;  %v414_v42 = vld [vmem:[%s3960_s3 + $0x18] sm:$0xff] }
  0x1a   :  { %2451 = vmatprep.subr.bf16.mxu0 %v2450_v14  ;;  %v110_v30 = vld [vmem:[#allocation2 + $0x10] sm:$0xff]  ;;  %v112_v39 = vld [vmem:[#allocation2 + $0x20] sm:$0xff]  ;;  %v432_v45 = vld [vmem:[%s3960_s3 + $0xa8] sm:$0xff]  ;;  %v2496_v48 = vpack.c.bf16 %v414_v42, %v413_v41  ;;  %375 = vst.msk [vmem:[#allocation2] sm:$0x1] %vm374_vm6, %v2811_v3 }
  0x1b   :  { %2230 = vmatprep.mubr.f32.mxu1 %v110_v30  ;;  %v431_v44 = vld [vmem:[%s3960_s3 + $0xa0] sm:$0xff]  ;;  %v111_v47 = vld [vmem:[#allocation2 + $0x18] sm:$0xff]  ;;  %v416_v52 = vld [vmem:[%s3960_s3 + $0x28] sm:$0xff] }
  0x1c   :  { %2481 = vmatpush3.bf16.msra.mxu1 %v2478_v4  ;;  %v115_v49 = vld [vmem:[#allocation2 + $0x38] sm:$0xff]  ;;  %v2498_v50 = vpack.c.bf16 %v432_v45, %v431_v44  ;;  %v415_v51 = vld [vmem:[%s3960_s3 + $0x20] sm:$0xff]  ;;  %v118_v56 = vld [vmem:[#allocation2 + $0x50] sm:$0xff] }
  0x1d   :  { %2483 = vmatprep.subr.bf16.mxu1 %v2482_v19  ;;  %2453 = vmatpush3.bf16.msra.mxu0 %v2452_v21  ;;  %v113_v43 = vld [vmem:[#allocation2 + $0x28] sm:$0xff]  ;;  %v119_v53 = vld [vmem:[#allocation2 + $0x58] sm:$0xff]  ;;  %v114_v54 = vld [vmem:[#allocation2 + $0x30] sm:$0xff]  ;;  %v2500_v55 = vpack.c.bf16 %v416_v52, %v415_v51 }
  0x1e   :  { %2455 = vmatprep.subr.bf16.mxu0 %v2454_v24  ;;  %v116_v46 = vld [vmem:[#allocation2 + $0x40] sm:$0xff]  ;;  %v117_v57 = vld [vmem:[#allocation2 + $0x48] sm:$0xff]  ;;  %v433_v61 = vld [vmem:[%s3960_s3 + $0xb0] sm:$0xff]  ;;  %398 = vst.msk [vmem:[#allocation2 + $0x5f] sm:$0x1] %vm374_vm6, %v2811_v3 }
  0x1f   :  { %v443_v58 = vld [vmem:[%s3960_s3 + $0x100] sm:$0xff]  ;;  %v444_v59 = vld [vmem:[%s3960_s3 + $0x108] sm:$0xff]  ;;  %v434_v62 = vld [vmem:[%s3960_s3 + $0xb8] sm:$0xff] }
  0x20   :  { %2485 = vmatpush3.bf16.msra.mxu1 %v2482_v19  ;;  %v2522_v60 = vpack.c.bf16 %v444_v59, %v443_v58  ;;  %v2502_v63 = vpack.c.bf16 %v434_v62, %v433_v61  ;;  %v417_v0 = vld [vmem:[%s3960_s3 + $0x30] sm:$0xff]  ;;  %v418_v1 = vld [vmem:[%s3960_s3 + $0x38] sm:$0xff]  ;;  %v435_v7 = vld [vmem:[%s3960_s3 + $0xc0] sm:$0xff] }
  0x21   :  { %2487 = vmatprep.subr.bf16.mxu1 %v2486_v29  ;;  %2457 = vmatpush3.bf16.msra.mxu0 %v2456_v31  ;;  %v2504_v2 = vpack.c.bf16 %v418_v1, %v417_v0  ;;  %v445_v4 = vld [vmem:[%s3960_s3 + $0x110] sm:$0xff]  ;;  %v446_v5 = vld [vmem:[%s3960_s3 + $0x118] sm:$0xff]  ;;  %v436_v8 = vld [vmem:[%s3960_s3 + $0xc8] sm:$0xff] }
  0x22   :  { %2491 = vmatprep.subr.bf16.mxu0 %v2490_v32  ;;  %v2526_v6 = vpack.c.bf16 %v446_v5, %v445_v4  ;;  %v2506_v9 = vpack.c.bf16 %v436_v8, %v435_v7  ;;  %v419_v10 = vld [vmem:[%s3960_s3 + $0x40] sm:$0xff]  ;;  %v420_v11 = vld [vmem:[%s3960_s3 + $0x48] sm:$0xff]  ;;  %v437_v16 = vld [vmem:[%s3960_s3 + $0xd0] sm:$0xff] }
  0x23   :  { %v2508_v12 = vpack.c.bf16 %v420_v11, %v419_v10  ;;  %v447_v13 = vld [vmem:[%s3960_s3 + $0x120] sm:$0xff]  ;;  %v448_v14 = vld [vmem:[%s3960_s3 + $0x128] sm:$0xff]  ;;  %v438_v17 = vld [vmem:[%s3960_s3 + $0xd8] sm:$0xff] }
  0x24   :  { %2489 = vmatpush3.bf16.msra.mxu1 %v2486_v29  ;;  %240 = vmatmul.mubr.f32.vlgmr.msra.gmra.mrb[0].mxu0 %v108_v37  ;;  %v2530_v15 = vpack.c.bf16 %v448_v14, %v447_v13  ;;  %v2510_v18 = vpack.c.bf16 %v438_v17, %v437_v16  ;;  %v421_v19 = vld [vmem:[%s3960_s3 + $0x50] sm:$0xff]  ;;  %v422_v20 = vld [vmem:[%s3960_s3 + $0x58] sm:$0xff]  ;;  %v439_v25 = vld [vmem:[%s3960_s3 + $0xe0] sm:$0xff] }
  0x25   :  { %244 = vmatprep.mubr.f32.mxu0 %v112_v39  ;;  %2493 = vmatpush3.bf16.msra.mxu0 %v2492_v38  ;;  %v2512_v21 = vpack.c.bf16 %v422_v20, %v421_v19  ;;  %v449_v22 = vld [vmem:[%s3960_s3 + $0x130] sm:$0xff]  ;;  %v450_v23 = vld [vmem:[%s3960_s3 + $0x138] sm:$0xff]  ;;  %v440_v26 = vld [vmem:[%s3960_s3 + $0xe8] sm:$0xff] }
  0x26   :  { %2495 = vmatprep.subr.bf16.mxu0 %v2494_v40  ;;  %2523 = vmatprep.subr.bf16.mxu1 %v2522_v60  ;;  %v2534_v24 = vpack.c.bf16 %v450_v23, %v449_v22  ;;  %v2514_v27 = vpack.c.bf16 %v440_v26, %v439_v25  ;;  %v423_v28 = vld [vmem:[%s3960_s3 + $0x60] sm:$0xff]  ;;  %v424_v29 = vld [vmem:[%s3960_s3 + $0x68] sm:$0xff]  ;;  %v441_v34 = vld [vmem:[%s3960_s3 + $0xf0] sm:$0xff] }
  0x27   :  { %2231 = vmatmul.mubr.f32.vlgmr.msra.gmra.mrb[0].mxu1 %v113_v43  ;;  %v2516_v30 = vpack.c.bf16 %v424_v29, %v423_v28  ;;  %v451_v31 = vld [vmem:[%s3960_s3 + $0x140] sm:$0xff]  ;;  %v452_v32 = vld [vmem:[%s3960_s3 + $0x148] sm:$0xff]  ;;  %v442_v35 = vld [vmem:[%s3960_s3 + $0xf8] sm:$0xff] }
  0x28   :  { %2233 = vmatprep.mubr.f32.mxu1 %v116_v46  ;;  %245 = vmatmul.mubr.f32.gmra.mrb[2].mxu0 %v111_v47  ;;  %v2538_v33 = vpack.c.bf16 %v452_v32, %v451_v31  ;;  %v2518_v36 = vpack.c.bf16 %v442_v35, %v441_v34  ;;  %v425_v37 = vld [vmem:[%s3960_s3 + $0x70] sm:$0xff]  ;;  %v426_v38 = vld [vmem:[%s3960_s3 + $0x78] sm:$0xff]  ;;  %v455_v43 = vld [vmem:[%s3960_s3 + $0x160] sm:$0xff] }
  0x29   :  { %249 = vmatprep.mubr.f32.mxu0 %v115_v49  ;;  %2497 = vmatpush3.bf16.msra.mxu0 %v2496_v48  ;;  %v2520_v39 = vpack.c.bf16 %v426_v38, %v425_v37  ;;  %v453_v40 = vld [vmem:[%s3960_s3 + $0x150] sm:$0xff]  ;;  %v454_v41 = vld [vmem:[%s3960_s3 + $0x158] sm:$0xff]  ;;  %v456_v44 = vld [vmem:[%s3960_s3 + $0x168] sm:$0xff] }
  0x2a   :  { %2499 = vmatprep.subr.bf16.mxu0 %v2498_v50  ;;  %2525 = vmatpush3.bf16.msra.mxu1 %v2522_v60  ;;  %v2542_v42 = vpack.c.bf16 %v454_v41, %v453_v40  ;;  %v2546_v45 = vpack.c.bf16 %v456_v44, %v455_v43  ;;  %v457_v46 = vld [vmem:[%s3960_s3 + $0x170] sm:$0xff]  ;;  %v458_v47 = vld [vmem:[%s3960_s3 + $0x178] sm:$0xff]  ;;  %v714_v49 = vld [vmem:[%s3961_s5 + $0x80] sm:$0xff] }
  0x2b   :  { %2234 = vmatmul.mubr.f32.gmra.mrb[2].mxu1 %v119_v53  ;;  %2527 = vmatprep.subr.bf16.mxu1 %v2526_v6  ;;  %v2550_v48 = vpack.c.bf16 %v458_v47, %v457_v46  ;;  %v715_v50 = vld [vmem:[%s3961_s5 + $0x88] sm:$0xff]  ;;  %v698_v22 = vld [vmem:[%s3961_s5] sm:$0xff] }
  0x2c   :  { %250 = vmatmul.mubr.f32.gmra.mrb[4].mxu0 %v114_v54  ;;  %v2554_v51 = vpack.c.bf16 %v715_v50, %v714_v49  ;;  %v1808_v54 = vld [vmem:[%s3962_s2] ss:$0 sm:$0xff]  ;;  %v699_v23 = vld [vmem:[%s3961_s5 + $0x8] sm:$0xff] }
  0x2d   :  { %254 = vmatprep.mubr.f32.mxu0 %v118_v56  ;;  %2501 = vmatpush3.bf16.msra.mxu0 %v2500_v55  ;;  %v2556_v29 = vpack.c.bf16 %v699_v23, %v698_v22  ;;  %v737_v22 = vld [vmem:[%s3961_s5 + $0x138] sm:$0xff] }
  0x2e   :  { %2503 = vmatprep.subr.bf16.mxu0 %v2502_v63  ;;  %2529 = vmatpush3.bf16.msra.mxu1 %v2526_v6 }
  0x2f   :  { %2531 = vmatprep.subr.bf16.mxu1 %v2530_v15 }
  0x30   :  { %255 = vmatmul.mubr.f32.gmra.mrb[6].mxu0 %v117_v57 }
  0x31   :  { %2505 = vmatpush3.bf16.msra.mxu0 %v2504_v2 }
  0x32   :  { %2507 = vmatprep.subr.bf16.mxu0 %v2506_v9  ;;  %2533 = vmatpush3.bf16.msra.mxu1 %v2530_v15 }
  0x33   :  { %2535 = vmatprep.subr.bf16.mxu1 %v2534_v24 }
  0x35   :  { %2509 = vmatpush3.bf16.msra.mxu0 %v2508_v12 }
  0x36   :  { %2511 = vmatprep.subr.bf16.mxu0 %v2510_v18  ;;  %2537 = vmatpush3.bf16.msra.mxu1 %v2534_v24 }
  0x37   :  { %2539 = vmatprep.subr.bf16.mxu1 %v2538_v33 }
  0x39   :  { %2513 = vmatpush3.bf16.msra.mxu0 %v2512_v21 }
  0x3a   :  { %2515 = vmatprep.subr.bf16.mxu0 %v2514_v27  ;;  %2541 = vmatpush3.bf16.msra.mxu1 %v2538_v33 }
  0x3b   :  { %2543 = vmatprep.subr.bf16.mxu1 %v2542_v42 }
  0x3d   :  { %2517 = vmatpush3.bf16.msra.mxu0 %v2516_v30 }
  0x3e   :  { %2519 = vmatprep.subr.bf16.mxu0 %v2518_v36  ;;  %2545 = vmatpush3.bf16.msra.mxu1 %v2542_v42 }
  0x3f   :  { %2547 = vmatprep.subr.bf16.mxu1 %v2546_v45 }
  0x41   :  { %2521 = vmatpush3.bf16.msra.mxu0 %v2520_v39 }
  0x42   :  { %2549 = vmatpush3.bf16.msra.mxu1 %v2546_v45  ;;  %2555 = vmatprep.subr.bf16.mxu0 %v2554_v51  ;;  %v716_v51 = vld [vmem:[%s3961_s5 + $0x90] sm:$0xff] }
  0x43   :  { %2551 = vmatprep.subr.bf16.mxu1 %v2550_v48 }
  0x46   :  { %2553 = vmatpush3.bf16.msra.mxu1 %v2550_v48 }
  0xf7   :  { %v1846_v52 = vpop.f32.mrb[0].mxu0 }
  0xf8   :  { %v1847_v53 = vpop.f32.mrb[1].mxu0 }
  0xf9   :  { %v1848_v55 = vadd.f32 %v1847_v53, %v1846_v52  ;;  %v717_v52 = vld [vmem:[%s3961_s5 + $0x98] sm:$0xff] }
  0xfa   :  { %v2232_v56 = vpop.f32.mrb[0].mxu1  ;;  %v2558_v53 = vpack.c.bf16 %v717_v52, %v716_v51  ;;  %v744_v51 = vld [vmem:[%s3961_s5 + $0x170] sm:$0xff]  ;;  %v745_v52 = vld [vmem:[%s3961_s5 + $0x178] sm:$0xff] }
  0xfb   :  { %v326_v57 = vpop.f32.mrb[1].mxu1  ;;  %v1849_v58 = vpop.f32.mrb[2].mxu0  ;;  %v242_v59 = vadd.f32 %v1848_v55, %v1808_v54  ;;  %v701_v55 = vld [vmem:[%s3961_s5 + $0x18] sm:$0xff] }
  0xfc   :  { %v1850_v60 = vpop.f32.mrb[3].mxu0 }
  0xfd   :  { %v1851_v61 = vadd.f32 %v1850_v60, %v1849_v58  ;;  %v327_v62 = vadd.f32 %v326_v57, %v242_v59  ;;  %v730_v57 = vld [vmem:[%s3961_s5 + $0x100] sm:$0xff]  ;;  %v731_v58 = vld [vmem:[%s3961_s5 + $0x108] sm:$0xff] }
  0xfe   :  { %v2235_v63 = vpop.f32.mrb[2].mxu1  ;;  %v2586_v59 = vpack.c.bf16 %v731_v58, %v730_v57  ;;  %v718_v60 = vld [vmem:[%s3961_s5 + $0xa0] sm:$0xff] }
  0xff   :  { %v336_v0 = vpop.f32.mrb[3].mxu1  ;;  %v247_v1 = vadd.f32 %v1851_v61, %v1808_v54  ;;  %v345_v2 = vmul.f32 0.1, %v327_v62  ;;  %v1852_v4 = vpop.f32.mrb[4].mxu0  ;;  %v719_v61 = vld [vmem:[%s3961_s5 + $0xa8] sm:$0xff] }
 0x100   :  { %v1853_v5 = vpop.f32.mrb[5].mxu0  ;;  %2587 = vmatprep.subr.bf16.mxu1 %v2586_v59 }
 0x101   :  { %v332_v6 = vadd.f32 %v2232_v56, %v247_v1  ;;  %v349_v7 = vmax.f32 %v327_v62, %v345_v2  ;;  %v1854_v8 = vadd.f32 %v1853_v5, %v1852_v4  ;;  %v2562_v62 = vpack.c.bf16 %v719_v61, %v718_v60  ;;  %v732_v2 = vld [vmem:[%s3961_s5 + $0x110] sm:$0xff]  ;;  %v733_v4 = vld [vmem:[%s3961_s5 + $0x118] sm:$0xff] }
 0x102   :  { %v2590_v5 = vpack.c.bf16 %v733_v4, %v732_v2 }
 0x103   :  { %v346_v9 = vmul.f32 0.1, %v332_v6  ;;  %v357_v10 = vrot.slane %v349_v7, 7  ;;  %377 = vst.msk [vmem:[#allocation2 + $0x8] sm:$0xff] %vm370_vm7, %v349_v7  ;;  %v1855_v11 = vpop.f32.mrb[6].mxu0  ;;  %v252_v12 = vadd.f32 %v1854_v8, %v1808_v54  ;;  %v381_v17 = vrot.slane %v349_v7, 1 }
 0x104   :  { %v1856_v13 = vpop.f32.mrb[7].mxu0  ;;  %v721_v7 = vld [vmem:[%s3961_s5 + $0xb8] sm:$0xff] }
 0x105   :  { %v350_v14 = vmax.f32 %v332_v6, %v346_v9  ;;  %369 = vst.msk [vmem:[#allocation2] sm:$0xfe] %vm368_vm8, %v357_v10  ;;  %v337_v15 = vadd.f32 %v336_v0, %v252_v12  ;;  %v1857_v16 = vadd.f32 %v1856_v13, %v1855_v11  ;;  %v703_v0 = vld [vmem:[%s3961_s5 + $0x28] sm:$0xff]  ;;  %v720_v6 = vld [vmem:[%s3961_s5 + $0xb0] sm:$0xff]  ;;  %v734_v12 = vld [vmem:[%s3961_s5 + $0x120] sm:$0xff] }
 0x106   :  { %v2566_v8 = vpack.c.bf16 %v721_v7, %v720_v6  ;;  %v704_v9 = vld [vmem:[%s3961_s5 + $0x30] sm:$0xff]  ;;  %v735_v13 = vld [vmem:[%s3961_s5 + $0x128] sm:$0xff] }
 0x107   :  { %v358_v18 = vrot.slane %v350_v14, 7  ;;  %378 = vst.msk [vmem:[#allocation2 + $0x20] sm:$0xff] %vm370_vm7, %v350_v14  ;;  %v382_v19 = vrot.slane %v350_v14, 1  ;;  %v347_v20 = vmul.f32 0.1, %v337_v15  ;;  %v257_v21 = vadd.f32 %v1857_v16, %v1808_v54  ;;  %v700_v54 = vld [vmem:[%s3961_s5 + $0x10] sm:$0xff] }
 0x108   :  { %v2560_v56 = vpack.c.bf16 %v701_v55, %v700_v54  ;;  %v2594_v14 = vpack.c.bf16 %v735_v13, %v734_v12  ;;  %v723_v16 = vld [vmem:[%s3961_s5 + $0xc8] sm:$0xff]  ;;  %v1005_v54 = vld [vmem:[%s3963_s7 + $0x80] sm:$0xff] }
 0x109   :  { %v359_v24 = vsel %vm64_vm4, %v357_v10, %v358_v18  ;;  %v383_v25 = vsel %vm89_vm3, %v381_v17, %v382_v19  ;;  %v351_v26 = vmax.f32 %v337_v15, %v347_v20  ;;  %v342_v27 = vadd.f32 %v2235_v63, %v257_v21  ;;  %v702_v63 = vld [vmem:[%s3961_s5 + $0x20] sm:$0xff]  ;;  %v705_v10 = vld [vmem:[%s3961_s5 + $0x38] sm:$0xff]  ;;  %v736_v21 = vld [vmem:[%s3961_s5 + $0x130] sm:$0xff] }
 0x10a   :  { %371 = vst.msk [vmem:[#allocation2 + $0x18] sm:$0xff] %vm370_vm7, %v359_v24  ;;  %392 = vst.msk [vmem:[#allocation2 + $0x10] sm:$0xff] %vm370_vm7, %v383_v25  ;;  %v400_v28 = vld [vmem:[#allocation2 + $0x8] sm:$0xff]  ;;  %v2564_v1 = vpack.c.bf16 %v703_v0, %v702_v63  ;;  %v2568_v11 = vpack.c.bf16 %v705_v10, %v704_v9  ;;  %v722_v15 = vld [vmem:[%s3961_s5 + $0xc0] sm:$0xff]  ;;  %v2598_v23 = vpack.c.bf16 %v737_v22, %v736_v21 }
 0x10b   :  { %v360_v30 = vrot.slane %v351_v26, 7  ;;  %379 = vst.msk [vmem:[#allocation2 + $0x38] sm:$0xff] %vm370_vm7, %v351_v26  ;;  %v384_v31 = vrot.slane %v351_v26, 1  ;;  %v348_v32 = vmul.f32 0.1, %v342_v27  ;;  %530 = vmatprep.mubr.f32.mxu0 %v400_v28  ;;  %v2570_v17 = vpack.c.bf16 %v723_v16, %v722_v15  ;;  %v724_v24 = vld [vmem:[%s3961_s5 + $0xd0] sm:$0xff] }
 0x10c   :  { %v399_v33 = vld [vmem:[#allocation2] sm:$0xff]  ;;  %v725_v25 = vld [vmem:[%s3961_s5 + $0xd8] sm:$0xff]  ;;  %v1006_v55 = vld [vmem:[%s3963_s7 + $0x88] sm:$0xff] }
 0x10d   :  { %v361_v34 = vsel %vm64_vm4, %v358_v18, %v360_v30  ;;  %v385_v35 = vsel %vm89_vm3, %v382_v19, %v384_v31  ;;  %v352_v36 = vmax.f32 %v342_v27, %v348_v32  ;;  %531 = vmatmul.mubr.f32.vlgmr.msra.gmra.mrb[8].mxu0 %v399_v33  ;;  %663 = vst.msk [vmem:[#allocation2] sm:$0x1] %vm374_vm6, %v2811_v3  ;;  %v706_v18 = vld [vmem:[%s3961_s5 + $0x40] sm:$0xff]  ;;  %v707_v19 = vld [vmem:[%s3961_s5 + $0x48] sm:$0xff]  ;;  %v708_v27 = vld [vmem:[%s3961_s5 + $0x50] sm:$0xff] }
 0x10e   :  { %372 = vst.msk [vmem:[#allocation2 + $0x30] sm:$0xff] %vm370_vm7, %v361_v34  ;;  %393 = vst.msk [vmem:[#allocation2 + $0x28] sm:$0xff] %vm370_vm7, %v385_v35  ;;  %v403_v37 = vld [vmem:[#allocation2 + $0x20] sm:$0xff]  ;;  %2557 = vmatpush3.bf16.msra.mxu0 %v2556_v29  ;;  %v2572_v20 = vpack.c.bf16 %v707_v19, %v706_v18  ;;  %v2574_v26 = vpack.c.bf16 %v725_v25, %v724_v24  ;;  %v709_v28 = vld [vmem:[%s3961_s5 + $0x58] sm:$0xff] }
 0x10f   :  { %376 = vst.msk [vmem:[#allocation2 + $0x30] sm:$0x1] %vm374_vm6, %v2811_v3  ;;  %397 = vst.msk [vmem:[#allocation2 + $0x2f] sm:$0x1] %vm374_vm6, %v2811_v3  ;;  %v362_v38 = vrot.slane %v352_v36, 7  ;;  %v386_v39 = vrot.slane %v352_v36, 1  ;;  %535 = vmatprep.mubr.f32.mxu0 %v403_v37  ;;  %2559 = vmatprep.subr.bf16.mxu0 %v2558_v53  ;;  %v2576_v29 = vpack.c.bf16 %v709_v28, %v708_v27 }
 0x110   :  { %380 = vst.msk [vmem:[#allocation2 + $0x50] sm:$0xff] %vm370_vm7, %v352_v36  ;;  %v726_v33 = vld [vmem:[%s3961_s5 + $0xe0] sm:$0xff]  ;;  %v727_v34 = vld [vmem:[%s3961_s5 + $0xe8] sm:$0xff]  ;;  %v2614_v53 = vpack.c.bf16 %v745_v52, %v744_v51 }
 0x111   :  { %v363_v40 = vsel %vm64_vm4, %v360_v30, %v362_v38  ;;  %v387_v41 = vsel %vm89_vm3, %v384_v31, %v386_v39  ;;  %396 = vst.msk [vmem:[#allocation2 + $0x58] sm:$0x7f] %vm395_vm9, %v386_v39  ;;  %v402_v42 = vld [vmem:[#allocation2 + $0x18] sm:$0xff]  ;;  %v401_v43 = vld [vmem:[#allocation2 + $0x10] sm:$0xff]  ;;  %v738_v30 = vld [vmem:[%s3961_s5 + $0x140] sm:$0xff]  ;;  %v2578_v35 = vpack.c.bf16 %v727_v34, %v726_v33 }
 0x112   :  { %373 = vst.msk [vmem:[#allocation2 + $0x48] sm:$0xff] %vm370_vm7, %v363_v40  ;;  %394 = vst.msk [vmem:[#allocation2 + $0x40] sm:$0xff] %vm370_vm7, %v387_v41  ;;  %536 = vmatmul.mubr.f32.gmra.mrb[10].mxu0 %v402_v42  ;;  %2268 = vmatprep.mubr.f32.mxu1 %v401_v43  ;;  %v406_v44 = vld [vmem:[#allocation2 + $0x38] sm:$0xff]  ;;  %v739_v31 = vld [vmem:[%s3961_s5 + $0x148] sm:$0xff] }
 0x113   :  { %540 = vmatprep.mubr.f32.mxu0 %v406_v44  ;;  %2561 = vmatpush3.bf16.msra.mxu0 %v2560_v56  ;;  %v2602_v32 = vpack.c.bf16 %v739_v31, %v738_v30  ;;  %v710_v36 = vld [vmem:[%s3961_s5 + $0x60] sm:$0xff]  ;;  %v711_v37 = vld [vmem:[%s3961_s5 + $0x68] sm:$0xff]  ;;  %v740_v39 = vld [vmem:[%s3961_s5 + $0x150] sm:$0xff]  ;;  %v2618_v56 = vpack.c.bf16 %v1006_v55, %v1005_v54 }
 0x114   :  { %2563 = vmatprep.subr.bf16.mxu0 %v2562_v62  ;;  %v2580_v38 = vpack.c.bf16 %v711_v37, %v710_v36  ;;  %v741_v40 = vld [vmem:[%s3961_s5 + $0x158] sm:$0xff]  ;;  %v728_v42 = vld [vmem:[%s3961_s5 + $0xf0] sm:$0xff]  ;;  %v1809_v63 = vld [vmem:[%s3964_s4] ss:$0 sm:$0xff] }
 0x115   :  { %v2606_v41 = vpack.c.bf16 %v741_v40, %v740_v39  ;;  %v729_v43 = vld [vmem:[%s3961_s5 + $0xf8] sm:$0xff]  ;;  %v989_v34 = vld [vmem:[%s3963_s7] sm:$0xff]  ;;  %v1007_v39 = vld [vmem:[%s3963_s7 + $0x90] sm:$0xff] }
 0x116   :  { %v405_v45 = vld [vmem:[#allocation2 + $0x30] sm:$0xff]  ;;  %v404_v46 = vld [vmem:[#allocation2 + $0x28] sm:$0xff]  ;;  %v2582_v44 = vpack.c.bf16 %v729_v43, %v728_v42  ;;  %v1008_v40 = vld [vmem:[%s3963_s7 + $0x98] sm:$0xff] }
 0x117   :  { %v409_v47 = vld [vmem:[#allocation2 + $0x50] sm:$0xff]  ;;  %541 = vmatmul.mubr.f32.gmra.mrb[12].mxu0 %v405_v45  ;;  %2269 = vmatmul.mubr.f32.vlgmr.msra.gmra.mrb[4].mxu1 %v404_v46  ;;  %v713_v46 = vld [vmem:[%s3961_s5 + $0x78] sm:$0xff] }
 0x118   :  { %545 = vmatprep.mubr.f32.mxu0 %v409_v47  ;;  %v410_v48 = vld [vmem:[#allocation2 + $0x58] sm:$0xff]  ;;  %2589 = vmatpush3.bf16.msra.mxu1 %v2586_v59  ;;  %v712_v45 = vld [vmem:[%s3961_s5 + $0x70] sm:$0xff] }
 0x119   :  { %v407_v49 = vld [vmem:[#allocation2 + $0x40] sm:$0xff]  ;;  %v408_v50 = vld [vmem:[#allocation2 + $0x48] sm:$0xff]  ;;  %685 = vst.msk [vmem:[#allocation2 + $0x5f] sm:$0x1] %vm374_vm6, %v2811_v3  ;;  %2565 = vmatpush3.bf16.msra.mxu0 %v2564_v1  ;;  %2591 = vmatprep.subr.bf16.mxu1 %v2590_v5  ;;  %v2584_v47 = vpack.c.bf16 %v713_v46, %v712_v45  ;;  %v2622_v46 = vpack.c.bf16 %v1008_v40, %v1007_v39 }
 0x11a   :  { %2271 = vmatprep.mubr.f32.mxu1 %v407_v49  ;;  %2567 = vmatprep.subr.bf16.mxu0 %v2566_v8  ;;  %v743_v49 = vld [vmem:[%s3961_s5 + $0x168] sm:$0xff]  ;;  %v1001_v40 = vld [vmem:[%s3963_s7 + $0x60] sm:$0xff] }
 0x11b   :  { %546 = vmatmul.mubr.f32.gmra.mrb[14].mxu0 %v408_v50  ;;  %2272 = vmatmul.mubr.f32.gmra.mrb[6].mxu1 %v410_v48  ;;  %v742_v48 = vld [vmem:[%s3961_s5 + $0x160] sm:$0xff]  ;;  %v1030_v39 = vld [vmem:[%s3963_s7 + $0x148] sm:$0xff] }
 0x11c   :  { %2593 = vmatpush3.bf16.msra.mxu1 %v2590_v5  ;;  %v2610_v50 = vpack.c.bf16 %v743_v49, %v742_v48  ;;  %v992_v48 = vld [vmem:[%s3963_s7 + $0x18] sm:$0xff] }
 0x11d   :  { %2569 = vmatpush3.bf16.msra.mxu0 %v2568_v11  ;;  %2595 = vmatprep.subr.bf16.mxu1 %v2594_v14 }
 0x11e   :  { %2571 = vmatprep.subr.bf16.mxu0 %v2570_v17 }
 0x120   :  { %2597 = vmatpush3.bf16.msra.mxu1 %v2594_v14 }
 0x121   :  { %2573 = vmatpush3.bf16.msra.mxu0 %v2572_v20  ;;  %2599 = vmatprep.subr.bf16.mxu1 %v2598_v23 }
 0x122   :  { %2575 = vmatprep.subr.bf16.mxu0 %v2574_v26 }
 0x124   :  { %2601 = vmatpush3.bf16.msra.mxu1 %v2598_v23 }
 0x125   :  { %2577 = vmatpush3.bf16.msra.mxu0 %v2576_v29  ;;  %2603 = vmatprep.subr.bf16.mxu1 %v2602_v32 }
 0x126   :  { %2579 = vmatprep.subr.bf16.mxu0 %v2578_v35  ;;  %v990_v35 = vld [vmem:[%s3963_s7 + $0x8] sm:$0xff] }
 0x128   :  { %2605 = vmatpush3.bf16.msra.mxu1 %v2602_v32 }
 0x129   :  { %2581 = vmatpush3.bf16.msra.mxu0 %v2580_v38  ;;  %2607 = vmatprep.subr.bf16.mxu1 %v2606_v41 }
 0x12a   :  { %2583 = vmatprep.subr.bf16.mxu0 %v2582_v44  ;;  %v2620_v44 = vpack.c.bf16 %v990_v35, %v989_v34  ;;  %v1017_v35 = vld [vmem:[%s3963_s7 + $0xe0] sm:$0xff] }
 0x12c   :  { %2609 = vmatpush3.bf16.msra.mxu1 %v2606_v41 }
 0x12d   :  { %2585 = vmatpush3.bf16.msra.mxu0 %v2584_v47  ;;  %2611 = vmatprep.subr.bf16.mxu1 %v2610_v50  ;;  %v991_v47 = vld [vmem:[%s3963_s7 + $0x10] sm:$0xff] }
 0x12e   :  { %2619 = vmatprep.subr.bf16.mxu0 %v2618_v56 }
 0x130   :  { %2613 = vmatpush3.bf16.msra.mxu1 %v2610_v50 }
 0x131   :  { %2615 = vmatprep.subr.bf16.mxu1 %v2614_v53 }
 0x134   :  { %2617 = vmatpush3.bf16.msra.mxu1 %v2614_v53  ;;  %v2624_v53 = vpack.c.bf16 %v992_v48, %v991_v47  ;;  %v1032_v48 = vld [vmem:[%s3963_s7 + $0x158] sm:$0xff] }
 0x1e0   :  { %v1910_v57 = vpop.f32.mrb[8].mxu0 }
 0x1e1   :  { %v1911_v58 = vpop.f32.mrb[9].mxu0 }
 0x1e2   :  { %v1912_v59 = vadd.f32 %v1911_v58, %v1910_v57 }
 0x1e4   :  { %v533_v4 = vadd.f32 %v1912_v59, %v1809_v63 }
 0x1e5   :  { %v1913_v60 = vpop.f32.mrb[10].mxu0 }
 0x1e6   :  { %v1914_v61 = vpop.f32.mrb[11].mxu0 }
 0x1e7   :  { %v1915_v62 = vadd.f32 %v1914_v61, %v1913_v60 }
 0x1e9   :  { %v538_v0 = vadd.f32 %v1915_v62, %v1809_v63  ;;  %v1009_v62 = vld [vmem:[%s3963_s7 + $0xa0] sm:$0xff] }
 0x1ea   :  { %v1916_v1 = vpop.f32.mrb[12].mxu0  ;;  %v2270_v2 = vpop.f32.mrb[4].mxu1 }
 0x1eb   :  { %v623_v5 = vadd.f32 %v2270_v2, %v538_v0  ;;  %v1917_v6 = vpop.f32.mrb[13].mxu0  ;;  %v617_v7 = vpop.f32.mrb[5].mxu1  ;;  %v1021_v0 = vld [vmem:[%s3963_s7 + $0x100] sm:$0xff]  ;;  %v1022_v2 = vld [vmem:[%s3963_s7 + $0x108] sm:$0xff] }
 0x1ec   :  { %v1918_v8 = vadd.f32 %v1917_v6, %v1916_v1  ;;  %v618_v9 = vadd.f32 %v617_v7, %v533_v4  ;;  %v993_v4 = vld [vmem:[%s3963_s7 + $0x20] sm:$0xff]  ;;  %v2650_v6 = vpack.c.bf16 %v1022_v2, %v1021_v0 }
 0x1ed   :  { %v637_v10 = vmul.f32 0.1, %v623_v5 }
 0x1ee   :  { %v636_v11 = vmul.f32 0.1, %v618_v9  ;;  %v1919_v12 = vpop.f32.mrb[14].mxu0  ;;  %v2273_v13 = vpop.f32.mrb[6].mxu1  ;;  %v543_v14 = vadd.f32 %v1918_v8, %v1809_v63  ;;  %2651 = vmatprep.subr.bf16.mxu1 %v2650_v6  ;;  %v1011_v8 = vld [vmem:[%s3963_s7 + $0xb0] sm:$0xff] }
 0x1ef   :  { %v641_v15 = vmax.f32 %v623_v5, %v637_v10  ;;  %v1920_v16 = vpop.f32.mrb[15].mxu0  ;;  %v627_v17 = vpop.f32.mrb[7].mxu1  ;;  %v994_v5 = vld [vmem:[%s3963_s7 + $0x28] sm:$0xff]  ;;  %v1023_v10 = vld [vmem:[%s3963_s7 + $0x110] sm:$0xff] }
 0x1f0   :  { %v640_v18 = vmax.f32 %v618_v9, %v636_v11  ;;  %v1921_v19 = vadd.f32 %v1920_v16, %v1919_v12  ;;  %v628_v20 = vadd.f32 %v627_v17, %v543_v14  ;;  %v2628_v7 = vpack.c.bf16 %v994_v5, %v993_v4  ;;  %v1012_v9 = vld [vmem:[%s3963_s7 + $0xb8] sm:$0xff]  ;;  %v1013_v17 = vld [vmem:[%s3963_s7 + $0xc0] sm:$0xff] }
 0x1f1   :  { %v649_v21 = vrot.slane %v641_v15, 7  ;;  %666 = vst.msk [vmem:[#allocation2 + $0x20] sm:$0xff] %vm370_vm7, %v641_v15  ;;  %v670_v22 = vrot.slane %v641_v15, 1  ;;  %v2630_v11 = vpack.c.bf16 %v1012_v9, %v1011_v8  ;;  %v1024_v12 = vld [vmem:[%s3963_s7 + $0x118] sm:$0xff] }
 0x1f2   :  { %v648_v23 = vrot.slane %v640_v18, 7  ;;  %665 = vst.msk [vmem:[#allocation2 + $0x8] sm:$0xff] %vm370_vm7, %v640_v18  ;;  %v669_v24 = vrot.slane %v640_v18, 1  ;;  %v548_v25 = vadd.f32 %v1921_v19, %v1809_v63  ;;  %v638_v26 = vmul.f32 0.1, %v628_v20  ;;  %v1010_v63 = vld [vmem:[%s3963_s7 + $0xa8] sm:$0xff] }
 0x1f3   :  { %v2626_v1 = vpack.c.bf16 %v1010_v63, %v1009_v62  ;;  %v996_v14 = vld [vmem:[%s3963_s7 + $0x38] sm:$0xff]  ;;  %v2654_v15 = vpack.c.bf16 %v1024_v12, %v1023_v10  ;;  %v1014_v18 = vld [vmem:[%s3963_s7 + $0xc8] sm:$0xff]  ;;  %v1025_v19 = vld [vmem:[%s3963_s7 + $0x120] sm:$0xff] }
 0x1f4   :  { %v650_v27 = vsel %vm64_vm4, %v648_v23, %v649_v21  ;;  %659 = vst.msk [vmem:[#allocation2] sm:$0xfe] %vm368_vm8, %v648_v23  ;;  %v671_v28 = vsel %vm89_vm3, %v669_v24, %v670_v22  ;;  %v633_v29 = vadd.f32 %v2273_v13, %v548_v25  ;;  %v642_v30 = vmax.f32 %v628_v20, %v638_v26  ;;  %v995_v13 = vld [vmem:[%s3963_s7 + $0x30] sm:$0xff]  ;;  %v998_v23 = vld [vmem:[%s3963_s7 + $0x48] sm:$0xff] }
 0x1f5   :  { %660 = vst.msk [vmem:[#allocation2 + $0x18] sm:$0xff] %vm370_vm7, %v650_v27  ;;  %680 = vst.msk [vmem:[#allocation2 + $0x10] sm:$0xff] %vm370_vm7, %v671_v28  ;;  %v2632_v16 = vpack.c.bf16 %v996_v14, %v995_v13  ;;  %v2634_v20 = vpack.c.bf16 %v1014_v18, %v1013_v17  ;;  %v1015_v26 = vld [vmem:[%s3963_s7 + $0xd0] sm:$0xff]  ;;  %v1016_v27 = vld [vmem:[%s3963_s7 + $0xd8] sm:$0xff] }
 0x1f6   :  { %v639_v31 = vmul.f32 0.1, %v633_v29  ;;  %v651_v32 = vrot.slane %v642_v30, 7  ;;  %667 = vst.msk [vmem:[#allocation2 + $0x38] sm:$0xff] %vm370_vm7, %v642_v30  ;;  %v672_v33 = vrot.slane %v642_v30, 1  ;;  %v1027_v28 = vld [vmem:[%s3963_s7 + $0x130] sm:$0xff] }
 0x1f7   :  { %v1028_v30 = vld [vmem:[%s3963_s7 + $0x138] sm:$0xff] }
 0x1f8   :  { %v643_v36 = vmax.f32 %v633_v29, %v639_v31  ;;  %v652_v37 = vsel %vm64_vm4, %v649_v21, %v651_v32  ;;  %v673_v38 = vsel %vm89_vm3, %v670_v22, %v672_v33  ;;  %v690_v51 = vld [vmem:[#allocation2 + $0x20] sm:$0xff]  ;;  %v1026_v21 = vld [vmem:[%s3963_s7 + $0x128] sm:$0xff]  ;;  %v2638_v29 = vpack.c.bf16 %v1016_v27, %v1015_v26 }
 0x1f9   :  { %661 = vst.msk [vmem:[#allocation2 + $0x30] sm:$0xff] %vm370_vm7, %v652_v37  ;;  %681 = vst.msk [vmem:[#allocation2 + $0x28] sm:$0xff] %vm370_vm7, %v673_v38  ;;  %v687_v41 = vld [vmem:[#allocation2 + $0x8] sm:$0xff]  ;;  %v997_v22 = vld [vmem:[%s3963_s7 + $0x40] sm:$0xff]  ;;  %v2658_v24 = vpack.c.bf16 %v1026_v21, %v1025_v19  ;;  %v2662_v31 = vpack.c.bf16 %v1028_v30, %v1027_v28 }
 0x1fa   :  { %v653_v42 = vrot.slane %v643_v36, 7  ;;  %668 = vst.msk [vmem:[#allocation2 + $0x50] sm:$0xff] %vm370_vm7, %v643_v36  ;;  %v674_v43 = vrot.slane %v643_v36, 1  ;;  %817 = vmatprep.mubr.f32.mxu0 %v687_v41  ;;  %v2636_v25 = vpack.c.bf16 %v998_v23, %v997_v22  ;;  %v1018_v36 = vld [vmem:[%s3963_s7 + $0xe8] sm:$0xff]  ;;  %v1029_v37 = vld [vmem:[%s3963_s7 + $0x140] sm:$0xff] }
 0x1fb   :  { %664 = vst.msk [vmem:[#allocation2 + $0x30] sm:$0x1] %vm374_vm6, %v2811_v3  ;;  %684 = vst.msk [vmem:[#allocation2 + $0x2f] sm:$0x1] %vm374_vm6, %v2811_v3  ;;  %v686_v45 = vld [vmem:[#allocation2] sm:$0xff]  ;;  %v2642_v38 = vpack.c.bf16 %v1018_v36, %v1017_v35  ;;  %v1002_v41 = vld [vmem:[%s3963_s7 + $0x68] sm:$0xff] }
 0x1fc   :  { %683 = vst.msk [vmem:[#allocation2 + $0x58] sm:$0x7f] %vm395_vm9, %v674_v43  ;;  %v654_v49 = vsel %vm64_vm4, %v651_v32, %v653_v42  ;;  %v675_v50 = vsel %vm89_vm3, %v672_v33, %v674_v43  ;;  %818 = vmatmul.mubr.f32.vlgmr.msra.gmra.mrb[16].mxu0 %v686_v45  ;;  %v688_v52 = vld [vmem:[#allocation2 + $0x10] sm:$0xff]  ;;  %v689_v54 = vld [vmem:[#allocation2 + $0x18] sm:$0xff]  ;;  %v2666_v42 = vpack.c.bf16 %v1030_v39, %v1029_v37  ;;  %v1280_v35 = vld [vmem:[%s3965_s9] sm:$0xff] }
 0x1fd   :  { %953 = vst.msk [vmem:[#allocation2] sm:$0x1] %vm952_vm10, %v2811_v3  ;;  %822 = vmatprep.mubr.f32.mxu0 %v690_v51  ;;  %2306 = vmatprep.mubr.f32.mxu1 %v688_v52  ;;  %v693_v55 = vld [vmem:[#allocation2 + $0x38] sm:$0xff]  ;;  %v999_v32 = vld [vmem:[%s3963_s7 + $0x50] sm:$0xff]  ;;  %v2644_v43 = vpack.c.bf16 %v1002_v41, %v1001_v40  ;;  %v1281_v36 = vld [vmem:[%s3965_s9 + $0x8] sm:$0xff] }
 0x1fe   :  { %662 = vst.msk [vmem:[#allocation2 + $0x48] sm:$0xff] %vm370_vm7, %v654_v49  ;;  %682 = vst.msk [vmem:[#allocation2 + $0x40] sm:$0xff] %vm370_vm7, %v675_v50  ;;  %2621 = vmatpush3.bf16.msra.mxu0 %v2620_v44  ;;  %v1000_v33 = vld [vmem:[%s3963_s7 + $0x58] sm:$0xff]  ;;  %v1019_v44 = vld [vmem:[%s3963_s7 + $0xf0] sm:$0xff] }
 0x1ff   :  { %2623 = vmatprep.subr.bf16.mxu0 %v2622_v46  ;;  %v2640_v34 = vpack.c.bf16 %v1000_v33, %v999_v32  ;;  %v1020_v45 = vld [vmem:[%s3963_s7 + $0xf8] sm:$0xff]  ;;  %v1031_v46 = vld [vmem:[%s3963_s7 + $0x150] sm:$0xff] }
 0x200   :  { %823 = vmatmul.mubr.f32.gmra.mrb[18].mxu0 %v689_v54  ;;  %v2646_v47 = vpack.c.bf16 %v1020_v45, %v1019_v44  ;;  %v1003_v49 = vld [vmem:[%s3963_s7 + $0x70] sm:$0xff]  ;;  %v1004_v50 = vld [vmem:[%s3963_s7 + $0x78] sm:$0xff]  ;;  %v2670_v51 = vpack.c.bf16 %v1032_v48, %v1031_v46  ;;  %v1034_v54 = vld [vmem:[%s3963_s7 + $0x168] sm:$0xff]  ;;  %v2684_v44 = vpack.c.bf16 %v1281_v36, %v1280_v35 }
 0x201   :  { %827 = vmatprep.mubr.f32.mxu0 %v693_v55  ;;  %v696_v59 = vld [vmem:[#allocation2 + $0x50] sm:$0xff]  ;;  %v2648_v52 = vpack.c.bf16 %v1004_v50, %v1003_v49  ;;  %v1299_v39 = vld [vmem:[%s3965_s9 + $0x98] sm:$0xff] }
 0x202   :  { %v691_v56 = vld [vmem:[#allocation2 + $0x28] sm:$0xff]  ;;  %2625 = vmatpush3.bf16.msra.mxu0 %v2624_v53  ;;  %v692_v57 = vld [vmem:[#allocation2 + $0x30] sm:$0xff]  ;;  %v1033_v53 = vld [vmem:[%s3963_s7 + $0x160] sm:$0xff] }
 0x203   :  { %2307 = vmatmul.mubr.f32.vlgmr.msra.gmra.mrb[8].mxu1 %v691_v56  ;;  %v697_v58 = vld [vmem:[#allocation2 + $0x58] sm:$0xff]  ;;  %2627 = vmatprep.subr.bf16.mxu0 %v2626_v1  ;;  %v2674_v55 = vpack.c.bf16 %v1034_v54, %v1033_v53  ;;  %v1035_v56 = vld [vmem:[%s3963_s7 + $0x170] sm:$0xff]  ;;  %v1810_v1 = vld [vmem:[%s3966_s6] ss:$0 sm:$0xff] }
 0x204   :  { %828 = vmatmul.mubr.f32.gmra.mrb[20].mxu0 %v692_v57  ;;  %976 = vst.msk [vmem:[#allocation2 + $0x5f] sm:$0x1] %vm952_vm10, %v2811_v3  ;;  %2653 = vmatpush3.bf16.msra.mxu1 %v2650_v6  ;;  %v1036_v57 = vld [vmem:[%s3963_s7 + $0x178] sm:$0xff]  ;;  %v1282_v48 = vld [vmem:[%s3965_s9 + $0x10] sm:$0xff] }
 0x205   :  { %v694_v60 = vld [vmem:[#allocation2 + $0x40] sm:$0xff]  ;;  %832 = vmatprep.mubr.f32.mxu0 %v696_v59  ;;  %v695_v61 = vld [vmem:[#allocation2 + $0x48] sm:$0xff]  ;;  %2655 = vmatprep.subr.bf16.mxu1 %v2654_v15  ;;  %v1283_v49 = vld [vmem:[%s3965_s9 + $0x18] sm:$0xff] }
 0x206   :  { %2309 = vmatprep.mubr.f32.mxu1 %v694_v60  ;;  %2629 = vmatpush3.bf16.msra.mxu0 %v2628_v7  ;;  %v1296_v59 = vld [vmem:[%s3965_s9 + $0x80] sm:$0xff]  ;;  %v1297_v60 = vld [vmem:[%s3965_s9 + $0x88] sm:$0xff]  ;;  %v1307_v35 = vld [vmem:[%s3965_s9 + $0xd8] sm:$0xff] }
 0x207   :  { %2310 = vmatmul.mubr.f32.gmra.mrb[10].mxu1 %v697_v58  ;;  %2631 = vmatprep.subr.bf16.mxu0 %v2630_v11  ;;  %v2678_v58 = vpack.c.bf16 %v1036_v57, %v1035_v56 }
 0x208   :  { %833 = vmatmul.mubr.f32.gmra.mrb[22].mxu0 %v695_v61  ;;  %2657 = vmatpush3.bf16.msra.mxu1 %v2654_v15  ;;  %v2682_v61 = vpack.c.bf16 %v1297_v60, %v1296_v59 }
 0x209   :  { %2659 = vmatprep.subr.bf16.mxu1 %v2658_v24 }
 0x20a   :  { %2633 = vmatpush3.bf16.msra.mxu0 %v2632_v16 }
 0x20b   :  { %2635 = vmatprep.subr.bf16.mxu0 %v2634_v20 }
 0x20c   :  { %2661 = vmatpush3.bf16.msra.mxu1 %v2658_v24 }
 0x20d   :  { %2663 = vmatprep.subr.bf16.mxu1 %v2662_v31 }
 0x20e   :  { %2637 = vmatpush3.bf16.msra.mxu0 %v2636_v25 }
 0x20f   :  { %2639 = vmatprep.subr.bf16.mxu0 %v2638_v29 }
 0x210   :  { %2665 = vmatpush3.bf16.msra.mxu1 %v2662_v31 }
 0x211   :  { %2667 = vmatprep.subr.bf16.mxu1 %v2666_v42 }
 0x212   :  { %2641 = vmatpush3.bf16.msra.mxu0 %v2640_v34 }
 0x213   :  { %2643 = vmatprep.subr.bf16.mxu0 %v2642_v38  ;;  %v1298_v38 = vld [vmem:[%s3965_s9 + $0x90] sm:$0xff] }
 0x214   :  { %2669 = vmatpush3.bf16.msra.mxu1 %v2666_v42 }
 0x215   :  { %2671 = vmatprep.subr.bf16.mxu1 %v2670_v51 }
 0x216   :  { %2645 = vmatpush3.bf16.msra.mxu0 %v2644_v43 }
 0x217   :  { %2647 = vmatprep.subr.bf16.mxu0 %v2646_v47  ;;  %v2686_v47 = vpack.c.bf16 %v1299_v39, %v1298_v38  ;;  %v1291_v38 = vld [vmem:[%s3965_s9 + $0x58] sm:$0xff] }
 0x218   :  { %2673 = vmatpush3.bf16.msra.mxu1 %v2670_v51 }
 0x219   :  { %2675 = vmatprep.subr.bf16.mxu1 %v2674_v55 }
 0x21a   :  { %2649 = vmatpush3.bf16.msra.mxu0 %v2648_v52 }
 0x21b   :  { %2683 = vmatprep.subr.bf16.mxu0 %v2682_v61 }
 0x21c   :  { %2677 = vmatpush3.bf16.msra.mxu1 %v2674_v55  ;;  %v2688_v55 = vpack.c.bf16 %v1283_v49, %v1282_v48  ;;  %v1322_v49 = vld [vmem:[%s3965_s9 + $0x150] sm:$0xff] }
 0x21d   :  { %2679 = vmatprep.subr.bf16.mxu1 %v2678_v58 }
 0x220   :  { %2681 = vmatpush3.bf16.msra.mxu1 %v2678_v58 }
 0x2cf   :  { %v1974_v62 = vpop.f32.mrb[16].mxu0 }
 0x2d0   :  { %v1975_v63 = vpop.f32.mrb[17].mxu0 }
 0x2d1   :  { %v1976_v0 = vadd.f32 %v1975_v63, %v1974_v62 }
 0x2d3   :  { %v1977_v2 = vpop.f32.mrb[18].mxu0  ;;  %v820_v7 = vadd.f32 %v1976_v0, %v1810_v1 }
 0x2d4   :  { %v1978_v4 = vpop.f32.mrb[19].mxu0 }
 0x2d5   :  { %v1979_v5 = vadd.f32 %v1978_v4, %v1977_v2  ;;  %v1312_v4 = vld [vmem:[%s3965_s9 + $0x100] sm:$0xff] }
 0x2d6   :  { %v2308_v6 = vpop.f32.mrb[8].mxu1 }
 0x2d7   :  { %v904_v8 = vpop.f32.mrb[9].mxu1  ;;  %v825_v9 = vadd.f32 %v1979_v5, %v1810_v1  ;;  %v1980_v11 = vpop.f32.mrb[20].mxu0  ;;  %v1313_v5 = vld [vmem:[%s3965_s9 + $0x108] sm:$0xff] }
 0x2d8   :  { %v905_v10 = vadd.f32 %v904_v8, %v820_v7  ;;  %v1981_v12 = vpop.f32.mrb[21].mxu0  ;;  %v1300_v7 = vld [vmem:[%s3965_s9 + $0xa0] sm:$0xff]  ;;  %v1301_v8 = vld [vmem:[%s3965_s9 + $0xa8] sm:$0xff] }
 0x2d9   :  { %v910_v13 = vadd.f32 %v2308_v6, %v825_v9  ;;  %v1982_v15 = vadd.f32 %v1981_v12, %v1980_v11  ;;  %v2714_v6 = vpack.c.bf16 %v1313_v5, %v1312_v4  ;;  %v2690_v9 = vpack.c.bf16 %v1301_v8, %v1300_v7  ;;  %v1285_v11 = vld [vmem:[%s3965_s9 + $0x28] sm:$0xff] }
 0x2da   :  { %v923_v14 = vmul.f32 0.1, %v905_v10  ;;  %v2311_v16 = vpop.f32.mrb[10].mxu1 }
 0x2db   :  { %v914_v17 = vpop.f32.mrb[11].mxu1  ;;  %v924_v18 = vmul.f32 0.1, %v910_v13  ;;  %v830_v20 = vadd.f32 %v1982_v15, %v1810_v1  ;;  %v1983_v21 = vpop.f32.mrb[22].mxu0  ;;  %2715 = vmatprep.subr.bf16.mxu1 %v2714_v6 }
 0x2dc   :  { %v927_v19 = vmax.f32 %v905_v10, %v923_v14  ;;  %v1984_v22 = vpop.f32.mrb[23].mxu0  ;;  %v1284_v10 = vld [vmem:[%s3965_s9 + $0x20] sm:$0xff]  ;;  %v1315_v14 = vld [vmem:[%s3965_s9 + $0x118] sm:$0xff] }
 0x2dd   :  { %v928_v23 = vmax.f32 %v910_v13, %v924_v18  ;;  %v915_v25 = vadd.f32 %v914_v17, %v830_v20  ;;  %v1985_v26 = vadd.f32 %v1984_v22, %v1983_v21  ;;  %v2692_v12 = vpack.c.bf16 %v1285_v11, %v1284_v10  ;;  %v1314_v13 = vld [vmem:[%s3965_s9 + $0x110] sm:$0xff]  ;;  %v1303_v17 = vld [vmem:[%s3965_s9 + $0xb8] sm:$0xff]  ;;  %v1316_v22 = vld [vmem:[%s3965_s9 + $0x120] sm:$0xff] }
 0x2de   :  { %v935_v24 = vrot.slane %v927_v19, 7  ;;  %955 = vst.msk [vmem:[#allocation2 + $0x8] sm:$0xff] %vm948_vm11, %v927_v19  ;;  %v959_v29 = vrot.slane %v927_v19, 1  ;;  %v2718_v15 = vpack.c.bf16 %v1315_v14, %v1314_v13  ;;  %v1286_v19 = vld [vmem:[%s3965_s9 + $0x30] sm:$0xff]  ;;  %v1287_v20 = vld [vmem:[%s3965_s9 + $0x38] sm:$0xff] }
 0x2df   :  { %v936_v27 = vrot.slane %v928_v23, 7  ;;  %956 = vst.msk [vmem:[#allocation2 + $0x20] sm:$0xff] %vm948_vm11, %v928_v23  ;;  %v960_v28 = vrot.slane %v928_v23, 1  ;;  %v925_v30 = vmul.f32 0.1, %v915_v25  ;;  %v835_v31 = vadd.f32 %v1985_v26, %v1810_v1  ;;  %v1317_v23 = vld [vmem:[%s3965_s9 + $0x128] sm:$0xff] }
 0x2e0   :  { %947 = vst.msk [vmem:[#allocation2] sm:$0xfe] %vm946_vm12, %v935_v24  ;;  %v2696_v21 = vpack.c.bf16 %v1287_v20, %v1286_v19  ;;  %v1305_v26 = vld [vmem:[%s3965_s9 + $0xc8] sm:$0xff] }
 0x2e1   :  { %v937_v32 = vsel %vm64_vm4, %v935_v24, %v936_v27  ;;  %v961_v33 = vsel %vm89_vm3, %v959_v29, %v960_v28  ;;  %v929_v34 = vmax.f32 %v915_v25, %v925_v30  ;;  %v920_v37 = vadd.f32 %v2311_v16, %v835_v31  ;;  %v1302_v16 = vld [vmem:[%s3965_s9 + $0xb0] sm:$0xff]  ;;  %v1304_v25 = vld [vmem:[%s3965_s9 + $0xc0] sm:$0xff]  ;;  %v1289_v29 = vld [vmem:[%s3965_s9 + $0x48] sm:$0xff] }
 0x2e2   :  { %949 = vst.msk [vmem:[#allocation2 + $0x18] sm:$0xff] %vm948_vm11, %v937_v32  ;;  %970 = vst.msk [vmem:[#allocation2 + $0x10] sm:$0xff] %vm948_vm11, %v961_v33  ;;  %v2694_v18 = vpack.c.bf16 %v1303_v17, %v1302_v16  ;;  %v2722_v24 = vpack.c.bf16 %v1317_v23, %v1316_v22  ;;  %v1318_v31 = vld [vmem:[%s3965_s9 + $0x130] sm:$0xff]  ;;  %v1319_v32 = vld [vmem:[%s3965_s9 + $0x138] sm:$0xff] }
 0x2e3   :  { %v938_v40 = vrot.slane %v929_v34, 7  ;;  %957 = vst.msk [vmem:[#allocation2 + $0x38] sm:$0xff] %vm948_vm11, %v929_v34  ;;  %v962_v41 = vrot.slane %v929_v34, 1  ;;  %v926_v42 = vmul.f32 0.1, %v920_v37  ;;  %v2726_v33 = vpack.c.bf16 %v1319_v32, %v1318_v31  ;;  %v1306_v34 = vld [vmem:[%s3965_s9 + $0xd0] sm:$0xff] }
 0x2e4   :  { %v2702_v36 = vpack.c.bf16 %v1307_v35, %v1306_v34 }
 0x2e5   :  { %v978_v43 = vld [vmem:[#allocation2 + $0x8] sm:$0xff]  ;;  %v939_v45 = vsel %vm64_vm4, %v936_v27, %v938_v40  ;;  %v963_v46 = vsel %vm89_vm3, %v960_v28, %v962_v41  ;;  %v930_v50 = vmax.f32 %v920_v37, %v926_v42  ;;  %v2698_v27 = vpack.c.bf16 %v1305_v26, %v1304_v25  ;;  %v1288_v28 = vld [vmem:[%s3965_s9 + $0x40] sm:$0xff]  ;;  %v1290_v37 = vld [vmem:[%s3965_s9 + $0x50] sm:$0xff] }
 0x2e6   :  { %1108 = vmatprep.mubr.f32.mxu0 %v978_v43  ;;  %950 = vst.msk [vmem:[#allocation2 + $0x30] sm:$0xff] %vm948_vm11, %v939_v45  ;;  %971 = vst.msk [vmem:[#allocation2 + $0x28] sm:$0xff] %vm948_vm11, %v963_v46  ;;  %v981_v52 = vld [vmem:[#allocation2 + $0x20] sm:$0xff]  ;;  %v2700_v30 = vpack.c.bf16 %v1289_v29, %v1288_v28  ;;  %v2704_v39 = vpack.c.bf16 %v1291_v38, %v1290_v37 }
 0x2e7   :  { %v977_v51 = vld [vmem:[#allocation2] sm:$0xff]  ;;  %954 = vst.msk [vmem:[#allocation2 + $0x30] sm:$0x1] %vm952_vm10, %v2811_v3  ;;  %975 = vst.msk [vmem:[#allocation2 + $0x2f] sm:$0x1] %vm952_vm10, %v2811_v3  ;;  %v940_v53 = vrot.slane %v930_v50, 7 }
 0x2e8   :  { %1109 = vmatmul.mubr.f32.vlgmr.msra.gmra.mrb[24].mxu0 %v977_v51  ;;  %1244 = vst.msk [vmem:[#allocation2] sm:$0x1] %vm1243_vm13, %v2811_v3  ;;  %v964_v54 = vrot.slane %v930_v50, 1  ;;  %v1308_v43 = vld [vmem:[%s3965_s9 + $0xe0] sm:$0xff] }
 0x2e9   :  { %958 = vst.msk [vmem:[#allocation2 + $0x50] sm:$0xff] %vm948_vm11, %v930_v50  ;;  %1113 = vmatprep.mubr.f32.mxu0 %v981_v52  ;;  %2685 = vmatpush3.bf16.msra.mxu0 %v2684_v44  ;;  %v979_v56 = vld [vmem:[#allocation2 + $0x10] sm:$0xff]  ;;  %v980_v57 = vld [vmem:[#allocation2 + $0x18] sm:$0xff]  ;;  %v941_v58 = vsel %vm64_vm4, %v938_v40, %v940_v53  ;;  %v1320_v40 = vld [vmem:[%s3965_s9 + $0x140] sm:$0xff] }
 0x2ea   :  { %2687 = vmatprep.subr.bf16.mxu0 %v2686_v47  ;;  %v965_v59 = vsel %vm89_vm3, %v962_v41, %v964_v54  ;;  %974 = vst.msk [vmem:[#allocation2 + $0x58] sm:$0x7f] %vm973_vm14, %v964_v54  ;;  %2344 = vmatprep.mubr.f32.mxu1 %v979_v56  ;;  %v984_v60 = vld [vmem:[#allocation2 + $0x38] sm:$0xff]  ;;  %v1321_v41 = vld [vmem:[%s3965_s9 + $0x148] sm:$0xff]  ;;  %v1292_v46 = vld [vmem:[%s3965_s9 + $0x60] sm:$0xff] }
 0x2eb   :  { %951 = vst.msk [vmem:[#allocation2 + $0x48] sm:$0xff] %vm948_vm11, %v941_v58  ;;  %972 = vst.msk [vmem:[#allocation2 + $0x40] sm:$0xff] %vm948_vm11, %v965_v59  ;;  %v2730_v42 = vpack.c.bf16 %v1321_v41, %v1320_v40  ;;  %v1309_v44 = vld [vmem:[%s3965_s9 + $0xe8] sm:$0xff]  ;;  %v1323_v50 = vld [vmem:[%s3965_s9 + $0x158] sm:$0xff] }
 0x2ec   :  { %1114 = vmatmul.mubr.f32.gmra.mrb[26].mxu0 %v980_v57  ;;  %v2706_v45 = vpack.c.bf16 %v1309_v44, %v1308_v43  ;;  %v1293_v47 = vld [vmem:[%s3965_s9 + $0x68] sm:$0xff]  ;;  %v2734_v51 = vpack.c.bf16 %v1323_v50, %v1322_v49  ;;  %v1310_v52 = vld [vmem:[%s3965_s9 + $0xf0] sm:$0xff]  ;;  %v1311_v53 = vld [vmem:[%s3965_s9 + $0xf8] sm:$0xff] }
 0x2ed   :  { %1118 = vmatprep.mubr.f32.mxu0 %v984_v60  ;;  %2689 = vmatpush3.bf16.msra.mxu0 %v2688_v55  ;;  %v2708_v48 = vpack.c.bf16 %v1293_v47, %v1292_v46  ;;  %v2710_v54 = vpack.c.bf16 %v1311_v53, %v1310_v52  ;;  %v1294_v55 = vld [vmem:[%s3965_s9 + $0x70] sm:$0xff]  ;;  %v1295_v56 = vld [vmem:[%s3965_s9 + $0x78] sm:$0xff]  ;;  %v1324_v58 = vld [vmem:[%s3965_s9 + $0x160] sm:$0xff] }
 0x2ee   :  { %v983_v61 = vld [vmem:[#allocation2 + $0x30] sm:$0xff]  ;;  %v982_v62 = vld [vmem:[#allocation2 + $0x28] sm:$0xff]  ;;  %2691 = vmatprep.subr.bf16.mxu0 %v2690_v9  ;;  %v2712_v57 = vpack.c.bf16 %v1295_v56, %v1294_v55  ;;  %v1811_v9 = vld [vmem:[%s3968_s8] ss:$0 sm:$0xff] }
 0x2ef   :  { %2345 = vmatmul.mubr.f32.vlgmr.msra.gmra.mrb[12].mxu1 %v982_v62  ;;  %v1325_v59 = vld [vmem:[%s3965_s9 + $0x168] sm:$0xff]  ;;  %v1327_v62 = vld [vmem:[%s3965_s9 + $0x178] sm:$0xff]  ;;  %v1567_v44 = vld [vmem:[%s3967_s11] sm:$0xff] }
 0x2f0   :  { %1119 = vmatmul.mubr.f32.gmra.mrb[28].mxu0 %v983_v61  ;;  %v987_v63 = vld [vmem:[#allocation2 + $0x50] sm:$0xff]  ;;  %2717 = vmatpush3.bf16.msra.mxu1 %v2714_v6  ;;  %v2738_v60 = vpack.c.bf16 %v1325_v59, %v1324_v58  ;;  %v1586_v47 = vld [vmem:[%s3967_s11 + $0x98] sm:$0xff] }
 0x2f1   :  { %1123 = vmatprep.mubr.f32.mxu0 %v987_v63  ;;  %v988_v0 = vld [vmem:[#allocation2 + $0x58] sm:$0xff]  ;;  %2693 = vmatpush3.bf16.msra.mxu0 %v2692_v12  ;;  %v1326_v61 = vld [vmem:[%s3965_s9 + $0x170] sm:$0xff] }
 0x2f2   :  { %v985_v1 = vld [vmem:[#allocation2 + $0x40] sm:$0xff]  ;;  %v986_v2 = vld [vmem:[#allocation2 + $0x48] sm:$0xff]  ;;  %1267 = vst.msk [vmem:[#allocation2 + $0x5f] sm:$0x1] %vm1243_vm13, %v2811_v3  ;;  %2719 = vmatprep.subr.bf16.mxu1 %v2718_v15  ;;  %2695 = vmatprep.subr.bf16.mxu0 %v2694_v18  ;;  %v2742_v63 = vpack.c.bf16 %v1327_v62, %v1326_v61  ;;  %v1585_v46 = vld [vmem:[%s3967_s11 + $0x90] sm:$0xff] }
 0x2f3   :  { %2347 = vmatprep.mubr.f32.mxu1 %v985_v1  ;;  %v1584_v1 = vld [vmem:[%s3967_s11 + $0x88] sm:$0xff]  ;;  %v2750_v56 = vpack.c.bf16 %v1586_v47, %v1585_v46  ;;  %v1570_v58 = vld [vmem:[%s3967_s11 + $0x18] sm:$0xff]  ;;  %v1607_v47 = vld [vmem:[%s3967_s11 + $0x140] sm:$0xff] }
 0x2f4   :  { %1124 = vmatmul.mubr.f32.gmra.mrb[30].mxu0 %v986_v2  ;;  %2348 = vmatmul.mubr.f32.gmra.mrb[14].mxu1 %v988_v0  ;;  %v1583_v0 = vld [vmem:[%s3967_s11 + $0x80] sm:$0xff]  ;;  %v1596_v46 = vld [vmem:[%s3967_s11 + $0xe8] sm:$0xff] }
 0x2f5   :  { %2721 = vmatpush3.bf16.msra.mxu1 %v2718_v15  ;;  %2697 = vmatpush3.bf16.msra.mxu0 %v2696_v21  ;;  %v2746_v2 = vpack.c.bf16 %v1584_v1, %v1583_v0 }
 0x2f6   :  { %2723 = vmatprep.subr.bf16.mxu1 %v2722_v24  ;;  %2699 = vmatprep.subr.bf16.mxu0 %v2698_v27 }
 0x2f9   :  { %2725 = vmatpush3.bf16.msra.mxu1 %v2722_v24  ;;  %2701 = vmatpush3.bf16.msra.mxu0 %v2700_v30 }
 0x2fa   :  { %2727 = vmatprep.subr.bf16.mxu1 %v2726_v33  ;;  %2703 = vmatprep.subr.bf16.mxu0 %v2702_v36 }
 0x2fd   :  { %2729 = vmatpush3.bf16.msra.mxu1 %v2726_v33  ;;  %2705 = vmatpush3.bf16.msra.mxu0 %v2704_v39 }
 0x2fe   :  { %2731 = vmatprep.subr.bf16.mxu1 %v2730_v42  ;;  %2707 = vmatprep.subr.bf16.mxu0 %v2706_v45  ;;  %v1568_v45 = vld [vmem:[%s3967_s11 + $0x8] sm:$0xff] }
 0x2ff   :  { %v2748_v52 = vpack.c.bf16 %v1568_v45, %v1567_v44  ;;  %v1595_v45 = vld [vmem:[%s3967_s11 + $0xe0] sm:$0xff] }
 0x301   :  { %2733 = vmatpush3.bf16.msra.mxu1 %v2730_v42  ;;  %2709 = vmatpush3.bf16.msra.mxu0 %v2708_v48 }
 0x302   :  { %2735 = vmatprep.subr.bf16.mxu1 %v2734_v51  ;;  %2711 = vmatprep.subr.bf16.mxu0 %v2710_v54 }
 0x305   :  { %2737 = vmatpush3.bf16.msra.mxu1 %v2734_v51  ;;  %2713 = vmatpush3.bf16.msra.mxu0 %v2712_v57  ;;  %v1569_v57 = vld [vmem:[%s3967_s11 + $0x10] sm:$0xff] }
 0x306   :  { %2739 = vmatprep.subr.bf16.mxu1 %v2738_v60  ;;  %2747 = vmatprep.subr.bf16.mxu0 %v2746_v2 }
 0x309   :  { %2741 = vmatpush3.bf16.msra.mxu1 %v2738_v60 }
 0x30a   :  { %2743 = vmatprep.subr.bf16.mxu1 %v2742_v63 }
 0x30d   :  { %2745 = vmatpush3.bf16.msra.mxu1 %v2742_v63  ;;  %v2752_v63 = vpack.c.bf16 %v1570_v58, %v1569_v57  ;;  %v1610_v58 = vld [vmem:[%s3967_s11 + $0x158] sm:$0xff] }
 0x3bb   :  { %v2038_v4 = vpop.f32.mrb[24].mxu0 }
 0x3bc   :  { %v2039_v5 = vpop.f32.mrb[25].mxu0 }
 0x3bd   :  { %v2040_v6 = vadd.f32 %v2039_v5, %v2038_v4 }
 0x3bf   :  { %v2041_v7 = vpop.f32.mrb[26].mxu0  ;;  %v1111_v14 = vadd.f32 %v2040_v6, %v1811_v9 }
 0x3c0   :  { %v2042_v8 = vpop.f32.mrb[27].mxu0 }
 0x3c1   :  { %v2043_v10 = vadd.f32 %v2042_v8, %v2041_v7 }
 0x3c2   :  { %v2346_v13 = vpop.f32.mrb[12].mxu1 }
 0x3c3   :  { %v2044_v11 = vpop.f32.mrb[28].mxu0  ;;  %v1116_v12 = vadd.f32 %v2043_v10, %v1811_v9  ;;  %v1195_v16 = vpop.f32.mrb[13].mxu1  ;;  %v1588_v10 = vld [vmem:[%s3967_s11 + $0xa8] sm:$0xff] }
 0x3c4   :  { %v2045_v15 = vpop.f32.mrb[29].mxu0  ;;  %v1196_v19 = vadd.f32 %v1195_v16, %v1111_v14  ;;  %v1571_v14 = vld [vmem:[%s3967_s11 + $0x20] sm:$0xff] }
 0x3c5   :  { %v1201_v17 = vadd.f32 %v2346_v13, %v1116_v12  ;;  %v2046_v18 = vadd.f32 %v2045_v15, %v2044_v11  ;;  %v1599_v11 = vld [vmem:[%s3967_s11 + $0x100] sm:$0xff]  ;;  %v1600_v13 = vld [vmem:[%s3967_s11 + $0x108] sm:$0xff] }
 0x3c6   :  { %v1214_v21 = vmul.f32 0.1, %v1196_v19  ;;  %v1572_v15 = vld [vmem:[%s3967_s11 + $0x28] sm:$0xff]  ;;  %v2778_v16 = vpack.c.bf16 %v1600_v13, %v1599_v11 }
 0x3c7   :  { %v1215_v20 = vmul.f32 0.1, %v1201_v17  ;;  %v2047_v22 = vpop.f32.mrb[30].mxu0  ;;  %v1121_v23 = vadd.f32 %v2046_v18, %v1811_v9  ;;  %v2349_v24 = vpop.f32.mrb[14].mxu1  ;;  %v1589_v18 = vld [vmem:[%s3967_s11 + $0xb0] sm:$0xff] }
 0x3c8   :  { %v2048_v25 = vpop.f32.mrb[31].mxu0  ;;  %v1218_v27 = vmax.f32 %v1196_v19, %v1214_v21  ;;  %v1205_v29 = vpop.f32.mrb[15].mxu1  ;;  %2779 = vmatprep.subr.bf16.mxu1 %v2778_v16  ;;  %v1590_v19 = vld [vmem:[%s3967_s11 + $0xb8] sm:$0xff] }
 0x3c9   :  { %v1219_v26 = vmax.f32 %v1201_v17, %v1215_v20  ;;  %v2049_v28 = vadd.f32 %v2048_v25, %v2047_v22  ;;  %v1206_v30 = vadd.f32 %v1205_v29, %v1121_v23  ;;  %v2756_v17 = vpack.c.bf16 %v1572_v15, %v1571_v14  ;;  %v1601_v20 = vld [vmem:[%s3967_s11 + $0x110] sm:$0xff]  ;;  %v1602_v22 = vld [vmem:[%s3967_s11 + $0x118] sm:$0xff]  ;;  %v1603_v29 = vld [vmem:[%s3967_s11 + $0x120] sm:$0xff] }
 0x3ca   :  { %v1226_v33 = vrot.slane %v1218_v27, 7  ;;  %1246 = vst.msk [vmem:[#allocation2 + $0x8] sm:$0xff] %vm1239_vm15, %v1218_v27  ;;  %v1250_v34 = vrot.slane %v1218_v27, 1  ;;  %v2758_v21 = vpack.c.bf16 %v1590_v19, %v1589_v18  ;;  %v1573_v23 = vld [vmem:[%s3967_s11 + $0x30] sm:$0xff]  ;;  %v2782_v25 = vpack.c.bf16 %v1602_v22, %v1601_v20  ;;  %v1591_v27 = vld [vmem:[%s3967_s11 + $0xc0] sm:$0xff] }
 0x3cb   :  { %v1227_v31 = vrot.slane %v1219_v26, 7  ;;  %1247 = vst.msk [vmem:[#allocation2 + $0x20] sm:$0xff] %vm1239_vm15, %v1219_v26  ;;  %v1251_v32 = vrot.slane %v1219_v26, 1  ;;  %v1126_v35 = vadd.f32 %v2049_v28, %v1811_v9  ;;  %v1216_v36 = vmul.f32 0.1, %v1206_v30  ;;  %v1587_v9 = vld [vmem:[%s3967_s11 + $0xa0] sm:$0xff] }
 0x3cc   :  { %1238 = vst.msk [vmem:[#allocation2] sm:$0xfe] %vm1237_vm0, %v1226_v33  ;;  %v2754_v12 = vpack.c.bf16 %v1588_v10, %v1587_v9  ;;  %v1592_v28 = vld [vmem:[%s3967_s11 + $0xc8] sm:$0xff]  ;;  %v1812_v10 = vld [vmem:[%s3969_s10] ss:$0 sm:$0xff] }
 0x3cd   :  { %v1228_v37 = vsel %vm64_vm4, %v1226_v33, %v1227_v31  ;;  %v1252_v38 = vsel %vm89_vm3, %v1250_v34, %v1251_v32  ;;  %v1211_v39 = vadd.f32 %v2349_v24, %v1126_v35  ;;  %v1220_v40 = vmax.f32 %v1206_v30, %v1216_v36  ;;  %v1574_v24 = vld [vmem:[%s3967_s11 + $0x38] sm:$0xff]  ;;  %v1576_v33 = vld [vmem:[%s3967_s11 + $0x48] sm:$0xff]  ;;  %v1593_v36 = vld [vmem:[%s3967_s11 + $0xd0] sm:$0xff] }
 0x3ce   :  { %1240 = vst.msk [vmem:[#allocation2 + $0x18] sm:$0xff] %vm1239_vm15, %v1228_v37  ;;  %1261 = vst.msk [vmem:[#allocation2 + $0x10] sm:$0xff] %vm1239_vm15, %v1252_v38  ;;  %v2760_v26 = vpack.c.bf16 %v1574_v24, %v1573_v23  ;;  %v2762_v30 = vpack.c.bf16 %v1592_v28, %v1591_v27  ;;  %v1594_v37 = vld [vmem:[%s3967_s11 + $0xd8] sm:$0xff]  ;;  %v1605_v38 = vld [vmem:[%s3967_s11 + $0x130] sm:$0xff] }
 0x3cf   :  { %v1217_v41 = vmul.f32 0.1, %v1211_v39  ;;  %v1229_v42 = vrot.slane %v1220_v40, 7  ;;  %1248 = vst.msk [vmem:[#allocation2 + $0x38] sm:$0xff] %vm1239_vm15, %v1220_v40  ;;  %v1253_v43 = vrot.slane %v1220_v40, 1  ;;  %v1606_v40 = vld [vmem:[%s3967_s11 + $0x138] sm:$0xff] }
 0x3d1   :  { %v1221_v48 = vmax.f32 %v1211_v39, %v1217_v41  ;;  %v1230_v49 = vsel %vm64_vm4, %v1227_v31, %v1229_v42  ;;  %v1254_v50 = vsel %vm89_vm3, %v1251_v32, %v1253_v43  ;;  %v1269_v51 = vld [vmem:[#allocation2 + $0x8] sm:$0xff]  ;;  %v1575_v32 = vld [vmem:[%s3967_s11 + $0x40] sm:$0xff]  ;;  %v2766_v39 = vpack.c.bf16 %v1594_v37, %v1593_v36  ;;  %v1577_v41 = vld [vmem:[%s3967_s11 + $0x50] sm:$0xff] }
 0x3d2   :  { %1241 = vst.msk [vmem:[#allocation2 + $0x30] sm:$0xff] %vm1239_vm15, %v1230_v49  ;;  %1262 = vst.msk [vmem:[#allocation2 + $0x28] sm:$0xff] %vm1239_vm15, %v1254_v50  ;;  %1399 = vmatprep.mubr.f32.mxu0 %v1269_v51  ;;  %v1272_v59 = vld [vmem:[#allocation2 + $0x20] sm:$0xff]  ;;  %v1604_v31 = vld [vmem:[%s3967_s11 + $0x128] sm:$0xff]  ;;  %v2764_v35 = vpack.c.bf16 %v1576_v33, %v1575_v32 }
 0x3d3   :  { %v1231_v53 = vrot.slane %v1221_v48, 7  ;;  %1249 = vst.msk [vmem:[#allocation2 + $0x50] sm:$0xff] %vm1239_vm15, %v1221_v48  ;;  %v1255_v54 = vrot.slane %v1221_v48, 1  ;;  %v1268_v55 = vld [vmem:[#allocation2] sm:$0xff]  ;;  %v2786_v34 = vpack.c.bf16 %v1604_v31, %v1603_v29  ;;  %v2770_v48 = vpack.c.bf16 %v1596_v46, %v1595_v45  ;;  %v1608_v49 = vld [vmem:[%s3967_s11 + $0x148] sm:$0xff] }
 0x3d4   :  { %1245 = vst.msk [vmem:[#allocation2 + $0x30] sm:$0x1] %vm1243_vm13, %v2811_v3  ;;  %1266 = vst.msk [vmem:[#allocation2 + $0x2f] sm:$0x1] %vm1243_vm13, %v2811_v3  ;;  %1400 = vmatmul.mubr.f32.vlgmr.msra.gmra.mrb[32].mxu0 %v1268_v55  ;;  %v1579_v50 = vld [vmem:[%s3967_s11 + $0x60] sm:$0xff]  ;;  %v1580_v51 = vld [vmem:[%s3967_s11 + $0x68] sm:$0xff] }
 0x3d5   :  { %1532 = vst.msk [vmem:[#allocation2] sm:$0x1] %vm1243_vm13, %v2811_v3  ;;  %v1270_v60 = vld [vmem:[#allocation2 + $0x10] sm:$0xff]  ;;  %v1232_v61 = vsel %vm64_vm4, %v1229_v42, %v1231_v53  ;;  %v1256_v62 = vsel %vm89_vm3, %v1253_v43, %v1255_v54  ;;  %1404 = vmatprep.mubr.f32.mxu0 %v1272_v59  ;;  %2749 = vmatpush3.bf16.msra.mxu0 %v2748_v52  ;;  %v1271_v0 = vld [vmem:[#allocation2 + $0x18] sm:$0xff] }
 0x3d6   :  { %2382 = vmatprep.mubr.f32.mxu1 %v1270_v60  ;;  %1265 = vst.msk [vmem:[#allocation2 + $0x58] sm:$0x7f] %vm1264_vm2, %v1255_v54  ;;  %2751 = vmatprep.subr.bf16.mxu0 %v2750_v56  ;;  %v1275_v1 = vld [vmem:[#allocation2 + $0x38] sm:$0xff]  ;;  %v2790_v43 = vpack.c.bf16 %v1606_v40, %v1605_v38  ;;  %v2794_v52 = vpack.c.bf16 %v1608_v49, %v1607_v47  ;;  %v1597_v54 = vld [vmem:[%s3967_s11 + $0xf0] sm:$0xff] }
 0x3d7   :  { %1242 = vst.msk [vmem:[#allocation2 + $0x48] sm:$0xff] %vm1239_vm15, %v1232_v61  ;;  %1263 = vst.msk [vmem:[#allocation2 + $0x40] sm:$0xff] %vm1239_vm15, %v1256_v62  ;;  %v1578_v42 = vld [vmem:[%s3967_s11 + $0x58] sm:$0xff]  ;;  %v2772_v53 = vpack.c.bf16 %v1580_v51, %v1579_v50  ;;  %v1609_v56 = vld [vmem:[%s3967_s11 + $0x150] sm:$0xff] }
 0x3d8   :  { %1405 = vmatmul.mubr.f32.gmra.mrb[34].mxu0 %v1271_v0  ;;  %v2768_v44 = vpack.c.bf16 %v1578_v42, %v1577_v41  ;;  %v1598_v55 = vld [vmem:[%s3967_s11 + $0xf8] sm:$0xff]  ;;  %v1581_v59 = vld [vmem:[%s3967_s11 + $0x70] sm:$0xff]  ;;  %v2798_v61 = vpack.c.bf16 %v1610_v58, %v1609_v56  ;;  %v1612_v0 = vld [vmem:[%s3967_s11 + $0x168] sm:$0xff] }
 0x3d9   :  { %1409 = vmatprep.mubr.f32.mxu0 %v1275_v1  ;;  %2753 = vmatpush3.bf16.msra.mxu0 %v2752_v63  ;;  %v2774_v57 = vpack.c.bf16 %v1598_v55, %v1597_v54  ;;  %v1582_v60 = vld [vmem:[%s3967_s11 + $0x78] sm:$0xff]  ;;  %v1611_v63 = vld [vmem:[%s3967_s11 + $0x160] sm:$0xff] }
 0x3da   :  { %v1278_v5 = vld [vmem:[#allocation2 + $0x50] sm:$0xff]  ;;  %2755 = vmatprep.subr.bf16.mxu0 %v2754_v12  ;;  %v2776_v62 = vpack.c.bf16 %v1582_v60, %v1581_v59  ;;  %v2802_v1 = vpack.c.bf16 %v1612_v0, %v1611_v63 }
 0x3db   :  { %v1273_v2 = vld [vmem:[#allocation2 + $0x28] sm:$0xff]  ;;  %v1274_v4 = vld [vmem:[#allocation2 + $0x30] sm:$0xff] }
 0x3dc   :  { %2383 = vmatmul.mubr.f32.vlgmr.msra.gmra.mrb[16].mxu1 %v1273_v2  ;;  %1410 = vmatmul.mubr.f32.gmra.mrb[36].mxu0 %v1274_v4  ;;  %v1613_v2 = vld [vmem:[%s3967_s11 + $0x170] sm:$0xff]  ;;  %v1614_v4 = vld [vmem:[%s3967_s11 + $0x178] sm:$0xff] }
 0x3dd   :  { %v1279_v6 = vld [vmem:[#allocation2 + $0x58] sm:$0xff]  ;;  %1414 = vmatprep.mubr.f32.mxu0 %v1278_v5  ;;  %2757 = vmatpush3.bf16.msra.mxu0 %v2756_v17  ;;  %v2806_v5 = vpack.c.bf16 %v1614_v4, %v1613_v2 }
 0x3de   :  { %v1276_v7 = vld [vmem:[#allocation2 + $0x40] sm:$0xff]  ;;  %1554 = vst.msk [vmem:[#allocation2 + $0x5f] sm:$0x1] %vm1243_vm13, %v2811_v3  ;;  %v1277_v8 = vld [vmem:[#allocation2 + $0x48] sm:$0xff]  ;;  %2781 = vmatpush3.bf16.msra.mxu1 %v2778_v16  ;;  %2759 = vmatprep.subr.bf16.mxu0 %v2758_v21 }
 0x3df   :  { %2385 = vmatprep.mubr.f32.mxu1 %v1276_v7  ;;  %2783 = vmatprep.subr.bf16.mxu1 %v2782_v25 }
 0x3e0   :  { %2386 = vmatmul.mubr.f32.gmra.mrb[18].mxu1 %v1279_v6  ;;  %1415 = vmatmul.mubr.f32.gmra.mrb[38].mxu0 %v1277_v8 }
 0x3e1   :  { %2761 = vmatpush3.bf16.msra.mxu0 %v2760_v26 }
 0x3e2   :  { %2785 = vmatpush3.bf16.msra.mxu1 %v2782_v25  ;;  %2763 = vmatprep.subr.bf16.mxu0 %v2762_v30 }
 0x3e3   :  { %2787 = vmatprep.subr.bf16.mxu1 %v2786_v34 }
 0x3e5   :  { %2765 = vmatpush3.bf16.msra.mxu0 %v2764_v35 }
 0x3e6   :  { %2789 = vmatpush3.bf16.msra.mxu1 %v2786_v34  ;;  %2767 = vmatprep.subr.bf16.mxu0 %v2766_v39 }
 0x3e7   :  { %2791 = vmatprep.subr.bf16.mxu1 %v2790_v43 }
 0x3e9   :  { %2769 = vmatpush3.bf16.msra.mxu0 %v2768_v44 }
 0x3ea   :  { %2793 = vmatpush3.bf16.msra.mxu1 %v2790_v43  ;;  %2771 = vmatprep.subr.bf16.mxu0 %v2770_v48 }
 0x3eb   :  { %2795 = vmatprep.subr.bf16.mxu1 %v2794_v52 }
 0x3ed   :  { %2773 = vmatpush3.bf16.msra.mxu0 %v2772_v53 }
 0x3ee   :  { %2797 = vmatpush3.bf16.msra.mxu1 %v2794_v52  ;;  %2775 = vmatprep.subr.bf16.mxu0 %v2774_v57 }
 0x3ef   :  { %2799 = vmatprep.subr.bf16.mxu1 %v2798_v61 }
 0x3f1   :  { %2777 = vmatpush3.bf16.msra.mxu0 %v2776_v62 }
 0x3f2   :  { %2801 = vmatpush3.bf16.msra.mxu1 %v2798_v61 }
 0x3f3   :  { %2803 = vmatprep.subr.bf16.mxu1 %v2802_v1 }
 0x3f6   :  { %2805 = vmatpush3.bf16.msra.mxu1 %v2802_v1 }
 0x3f7   :  { %2807 = vmatprep.subr.bf16.mxu1 %v2806_v5 }
 0x3fa   :  { %2809 = vmatpush3.bf16.msra.mxu1 %v2806_v5  ;;  %v1813_v5 = vld [vmem:[%s3970_s12] ss:$0 sm:$0xff] }
 0x4a7   :  { %v2102_v6 = vpop.f32.mrb[32].mxu0 }
 0x4a8   :  { %v2103_v7 = vpop.f32.mrb[33].mxu0 }
 0x4a9   :  { %v2104_v8 = vadd.f32 %v2103_v7, %v2102_v6 }
 0x4ab   :  { %v2105_v9 = vpop.f32.mrb[34].mxu0  ;;  %v1402_v14 = vadd.f32 %v2104_v8, %v1812_v10 }
 0x4ac   :  { %v2106_v11 = vpop.f32.mrb[35].mxu0 }
 0x4ad   :  { %v2107_v12 = vadd.f32 %v2106_v11, %v2105_v9 }
 0x4af   :  { %v2384_v13 = vpop.f32.mrb[16].mxu1  ;;  %v1407_v15 = vadd.f32 %v2107_v12, %v1812_v10  ;;  %v2108_v17 = vpop.f32.mrb[36].mxu0 }
 0x4b0   :  { %v1486_v16 = vpop.f32.mrb[17].mxu1  ;;  %v2109_v19 = vpop.f32.mrb[37].mxu0 }
 0x4b1   :  { %v1487_v18 = vadd.f32 %v1486_v16, %v1402_v14  ;;  %v1492_v20 = vadd.f32 %v2384_v13, %v1407_v15  ;;  %v2110_v21 = vadd.f32 %v2109_v19, %v2108_v17 }
 0x4b3   :  { %v1505_v22 = vmul.f32 0.1, %v1487_v18  ;;  %v2387_v23 = vpop.f32.mrb[18].mxu1  ;;  %v1506_v24 = vmul.f32 0.1, %v1492_v20  ;;  %v1412_v25 = vadd.f32 %v2110_v21, %v1812_v10  ;;  %v2111_v27 = vpop.f32.mrb[38].mxu0 }
 0x4b4   :  { %v1496_v26 = vpop.f32.mrb[19].mxu1  ;;  %v2112_v29 = vpop.f32.mrb[39].mxu0 }
 0x4b5   :  { %v1509_v28 = vmax.f32 %v1487_v18, %v1505_v22  ;;  %v1510_v30 = vmax.f32 %v1492_v20, %v1506_v24  ;;  %v1497_v31 = vadd.f32 %v1496_v26, %v1412_v25  ;;  %v2113_v32 = vadd.f32 %v2112_v29, %v2111_v27 }
 0x4b7   :  { %v1517_v33 = vrot.slane %v1509_v28, 7  ;;  %1534 = vst.msk [vmem:[#allocation2 + $0x8] sm:$0xff] %vm1239_vm15, %v1509_v28  ;;  %v1538_v34 = vrot.slane %v1509_v28, 1  ;;  %v1518_v35 = vrot.slane %v1510_v30, 7  ;;  %1535 = vst.msk [vmem:[#allocation2 + $0x20] sm:$0xff] %vm1239_vm15, %v1510_v30  ;;  %v1539_v36 = vrot.slane %v1510_v30, 1 }
 0x4b8   :  { %v1507_v37 = vmul.f32 0.1, %v1497_v31  ;;  %v1417_v38 = vadd.f32 %v2113_v32, %v1812_v10 }
 0x4b9   :  { %1528 = vst.msk [vmem:[#allocation2] sm:$0xfe] %vm1237_vm0, %v1517_v33  ;;  %v1519_v39 = vsel %vm64_vm4, %v1517_v33, %v1518_v35  ;;  %v1540_v40 = vsel %vm89_vm3, %v1538_v34, %v1539_v36 }
 0x4ba   :  { %v1511_v41 = vmax.f32 %v1497_v31, %v1507_v37  ;;  %v1502_v42 = vadd.f32 %v2387_v23, %v1417_v38  ;;  %1529 = vst.msk [vmem:[#allocation2 + $0x18] sm:$0xff] %vm1239_vm15, %v1519_v39  ;;  %1549 = vst.msk [vmem:[#allocation2 + $0x10] sm:$0xff] %vm1239_vm15, %v1540_v40 }
 0x4bc   :  { %v1520_v43 = vrot.slane %v1511_v41, 7  ;;  %1536 = vst.msk [vmem:[#allocation2 + $0x38] sm:$0xff] %vm1239_vm15, %v1511_v41  ;;  %v1541_v44 = vrot.slane %v1511_v41, 1  ;;  %v1508_v45 = vmul.f32 0.1, %v1502_v42 }
 0x4be   :  { %v1521_v46 = vsel %vm64_vm4, %v1518_v35, %v1520_v43  ;;  %v1542_v47 = vsel %vm89_vm3, %v1539_v36, %v1541_v44  ;;  %v1512_v48 = vmax.f32 %v1502_v42, %v1508_v45  ;;  %v1556_v49 = vld [vmem:[#allocation2 + $0x8] sm:$0xff]  ;;  %v1559_v50 = vld [vmem:[#allocation2 + $0x20] sm:$0xff] }
 0x4bf   :  { %1530 = vst.msk [vmem:[#allocation2 + $0x30] sm:$0xff] %vm1239_vm15, %v1521_v46  ;;  %1550 = vst.msk [vmem:[#allocation2 + $0x28] sm:$0xff] %vm1239_vm15, %v1542_v47  ;;  %1686 = vmatprep.mubr.f32.mxu0 %v1556_v49 }
 0x4c0   :  { %1533 = vst.msk [vmem:[#allocation2 + $0x30] sm:$0x1] %vm1243_vm13, %v2811_v3  ;;  %1553 = vst.msk [vmem:[#allocation2 + $0x2f] sm:$0x1] %vm1243_vm13, %v2811_v3  ;;  %v1522_v51 = vrot.slane %v1512_v48, 7  ;;  %v1543_v52 = vrot.slane %v1512_v48, 1 }
 0x4c1   :  { %1537 = vst.msk [vmem:[#allocation2 + $0x50] sm:$0xff] %vm1239_vm15, %v1512_v48  ;;  %v1555_v53 = vld [vmem:[#allocation2] sm:$0xff]  ;;  %v1557_v56 = vld [vmem:[#allocation2 + $0x10] sm:$0xff]  ;;  %v1558_v57 = vld [vmem:[#allocation2 + $0x18] sm:$0xff] }
 0x4c2   :  { %1687 = vmatmul.mubr.f32.vlgmr.msra.gmra.mrb[40].mxu0 %v1555_v53  ;;  %v1523_v54 = vsel %vm64_vm4, %v1520_v43, %v1522_v51  ;;  %v1544_v55 = vsel %vm89_vm3, %v1541_v44, %v1543_v52  ;;  %1552 = vst.msk [vmem:[#allocation2 + $0x58] sm:$0x7f] %vm1264_vm2, %v1543_v52  ;;  %2420 = vmatprep.mubr.f32.mxu1 %v1557_v56 }
 0x4c3   :  { %1691 = vmatprep.mubr.f32.mxu0 %v1559_v50  ;;  %1531 = vst.msk [vmem:[#allocation2 + $0x48] sm:$0xff] %vm1239_vm15, %v1523_v54  ;;  %1551 = vst.msk [vmem:[#allocation2 + $0x40] sm:$0xff] %vm1239_vm15, %v1544_v55  ;;  %v1562_v3 = vld [vmem:[#allocation2 + $0x38] sm:$0xff] }
 0x4c6   :  { %1692 = vmatmul.mubr.f32.gmra.mrb[42].mxu0 %v1558_v57 }
 0x4c7   :  { %1696 = vmatprep.mubr.f32.mxu0 %v1562_v3  ;;  %v1561_v58 = vld [vmem:[#allocation2 + $0x30] sm:$0xff]  ;;  %v1560_v59 = vld [vmem:[#allocation2 + $0x28] sm:$0xff] }
 0x4c8   :  { %v1565_v60 = vld [vmem:[#allocation2 + $0x50] sm:$0xff]  ;;  %2421 = vmatmul.mubr.f32.vlgmr.msra.gmra.mrb[20].mxu1 %v1560_v59 }
 0x4c9   :  { %v1566_v63 = vld [vmem:[#allocation2 + $0x58] sm:$0xff] }
 0x4ca   :  { %1697 = vmatmul.mubr.f32.gmra.mrb[44].mxu0 %v1561_v58  ;;  %v1563_v61 = vld [vmem:[#allocation2 + $0x40] sm:$0xff]  ;;  %v1564_v62 = vld [vmem:[#allocation2 + $0x48] sm:$0xff] }
 0x4cb   :  { %1701 = vmatprep.mubr.f32.mxu0 %v1565_v60  ;;  %2423 = vmatprep.mubr.f32.mxu1 %v1563_v61 }
 0x4cc   :  { %2424 = vmatmul.mubr.f32.gmra.mrb[22].mxu1 %v1566_v63 }
 0x4ce   :  { %1702 = vmatmul.mubr.f32.gmra.mrb[46].mxu0 %v1564_v62 }
 0x595   :  { %v2166_v0 = vpop.f32.mrb[40].mxu0 }
 0x596   :  { %v2167_v1 = vpop.f32.mrb[41].mxu0 }
 0x597   :  { %v2168_v2 = vadd.f32 %v2167_v1, %v2166_v0 }
 0x599   :  { %v2169_v4 = vpop.f32.mrb[42].mxu0  ;;  %v1689_v9 = vadd.f32 %v2168_v2, %v1813_v5 }
 0x59a   :  { %v2170_v6 = vpop.f32.mrb[43].mxu0 }
 0x59b   :  { %v2171_v7 = vadd.f32 %v2170_v6, %v2169_v4  ;;  %v2422_v8 = vpop.f32.mrb[20].mxu1 }
 0x59c   :  { %v1773_v12 = vpop.f32.mrb[21].mxu1 }
 0x59d   :  { %v2172_v10 = vpop.f32.mrb[44].mxu0  ;;  %v1694_v11 = vadd.f32 %v2171_v7, %v1813_v5  ;;  %v1774_v14 = vadd.f32 %v1773_v12, %v1689_v9 }
 0x59e   :  { %v2173_v13 = vpop.f32.mrb[45].mxu0 }
 0x59f   :  { %v1779_v15 = vadd.f32 %v2422_v8, %v1694_v11  ;;  %v2174_v16 = vadd.f32 %v2173_v13, %v2172_v10  ;;  %v1792_v17 = vmul.f32 0.1, %v1774_v14  ;;  %v2425_v18 = vpop.f32.mrb[22].mxu1 }
 0x5a0   :  { %v1783_v22 = vpop.f32.mrb[23].mxu1 }
 0x5a1   :  { %v1793_v19 = vmul.f32 0.1, %v1779_v15  ;;  %v2175_v20 = vpop.f32.mrb[46].mxu0  ;;  %v1699_v21 = vadd.f32 %v2174_v16, %v1813_v5  ;;  %v1796_v23 = vmax.f32 %v1774_v14, %v1792_v17 }
 0x5a2   :  { %v2176_v24 = vpop.f32.mrb[47].mxu0 }
 0x5a3   :  { %v1797_v25 = vmax.f32 %v1779_v15, %v1793_v19  ;;  %v2177_v26 = vadd.f32 %v2176_v24, %v2175_v20  ;;  %v1784_v27 = vadd.f32 %v1783_v22, %v1699_v21  ;;  %1800 = vst.msk [vmem:[%s3971_s13] sm:$0xff] %vm78_vm1, %v1796_v23 }
 0x5a5   :  { %1801 = vst.msk [vmem:[%s3971_s13 + $0x8] sm:$0xff] %vm78_vm1, %v1797_v25  ;;  %v1704_v28 = vadd.f32 %v2177_v26, %v1813_v5  ;;  %v1794_v29 = vmul.f32 0.1, %v1784_v27 }
 0x5a7   :  { %v1789_v30 = vadd.f32 %v2425_v18, %v1704_v28  ;;  %v1798_v31 = vmax.f32 %v1784_v27, %v1794_v29 }
 0x5a9   :  { %v1795_v32 = vmul.f32 0.1, %v1789_v30  ;;  %1802 = vst.msk [vmem:[%s3971_s13 + $0x10] sm:$0xff] %vm78_vm1, %v1798_v31 }
 0x5ab   :  { %v1799_v33 = vmax.f32 %v1789_v30, %v1795_v32 }
 0x5ad   :  { %1803 = vst.msk [vmem:[%s3971_s13 + $0x18] sm:$0xff] %vm78_vm1, %v1799_v33 }

</bundles_post_ra>
